<compile_context>
chip_gen: v6e
topology: v6e:2x2x1
jax: 0.10.0
libtpu: 0.0.40
codegen_flags: <defaults>
</compile_context>

<pallas_src>
import math
from functools import partial

import jax
import jax.numpy as jnp
from jax import lax
from jax.experimental import pallas as pl
from jax.experimental.pallas import tpu as pltpu

_INV_SQRT2 = 1.0 / math.sqrt(2.0)


def _round_up(n, m):
    return ((n + m - 1) // m) * m


def _gelu_exact_f32(h):
    # Exact (erf-based) GELU in f32 — matches torch.nn.GELU default.
    return 0.5 * h * (1.0 + lax.erf(h * _INV_SQRT2))


# ----------------------------------------------------------------------------
# Kernels
# ----------------------------------------------------------------------------
def _mlp_kernel_resident(x_ref, w1_ref, b1_ref, w2_ref, b2_ref, o_ref, *,
                         mxu_dtype):
    """Weight-resident path: full hidden dim per row tile, grid = (row_tiles,)."""
    x = x_ref[...]
    if x.dtype != mxu_dtype:
        x = x.astype(mxu_dtype)
    h = jnp.dot(x, w1_ref[...], preferred_element_type=jnp.float32)
    h = h + b1_ref[...].astype(jnp.float32)
    h = _gelu_exact_f32(h)
    # Dropout with p=0.0 is the identity (eval-mode semantics) — omitted.
    out = jnp.dot(h.astype(w2_ref.dtype), w2_ref[...],
                  preferred_element_type=jnp.float32)
    out = out + b2_ref[...].astype(jnp.float32)
    o_ref[...] = out.astype(o_ref.dtype)


def _mlp_kernel_streamed_f32out(x_ref, w1_ref, b1_ref, w2_ref, b2_ref, o_ref, *,
                                mxu_dtype):
    """Streamed fallback, f32 output: accumulate directly into the resident
    output block (no scratch)."""
    k = pl.program_id(1)

    @pl.when(k == 0)
    def _init():
        o_ref[...] = jnp.broadcast_to(
            b2_ref[...].astype(jnp.float32), o_ref.shape)

    x = x_ref[...]
    if x.dtype != mxu_dtype:
        x = x.astype(mxu_dtype)
    h = jnp.dot(x, w1_ref[...], preferred_element_type=jnp.float32)
    h = h + b1_ref[...].astype(jnp.float32)
    h = _gelu_exact_f32(h)
    o_ref[...] += jnp.dot(h.astype(w2_ref.dtype), w2_ref[...],
                          preferred_element_type=jnp.float32)


def _mlp_kernel_streamed_acc(x_ref, w1_ref, b1_ref, w2_ref, b2_ref, o_ref,
                             acc_ref, *, mxu_dtype):
    """Streamed fallback, non-f32 output: f32 scratch accumulator."""
    k = pl.program_id(1)

    @pl.when(k == 0)
    def _init():
        acc_ref[...] = jnp.broadcast_to(
            b2_ref[...].astype(jnp.float32), acc_ref.shape)

    x = x_ref[...]
    if x.dtype != mxu_dtype:
        x = x.astype(mxu_dtype)
    h = jnp.dot(x, w1_ref[...], preferred_element_type=jnp.float32)
    h = h + b1_ref[...].astype(jnp.float32)
    h = _gelu_exact_f32(h)
    acc_ref[...] += jnp.dot(h.astype(w2_ref.dtype), w2_ref[...],
                            preferred_element_type=jnp.float32)

    @pl.when(k == pl.num_programs(1) - 1)
    def _store():
        o_ref[...] = acc_ref[...].astype(o_ref.dtype)


# ----------------------------------------------------------------------------
# One-time parameter preparation (module init, NOT per forward)
# ----------------------------------------------------------------------------
def prepare_mlp_params(w1, b1, w2, b2, compute_dtype=None):
    """Pad Hid / Cout up to multiples of 128 and cast to the MXU compute dtype.

    w1: (Cin, Hid), b1: (Hid,), w2: (Hid, Cout), b2: (Cout,)  (torch weights
    pre-transposed to column-major-out layout).  Zero padding is numerically
    inert: GELU(0)=0 and the padded W2 rows / output lanes are zero.
    Call this ONCE and reuse the results for every forward.
    """
    cin, hid = w1.shape
    hid2, cout = w2.shape
    assert hid2 == hid and b1.shape == (hid,) and b2.shape == (cout,)
    dt = compute_dtype if compute_dtype is not None else w1.dtype
    hid_p = _round_up(hid, 128)
    cout_p = _round_up(cout, 128)
    w1p = jnp.pad(w1, ((0, 0), (0, hid_p - hid))).astype(dt)
    b1p = jnp.pad(b1, (0, hid_p - hid)).astype(dt).reshape(1, hid_p)
    w2p = jnp.pad(w2, ((0, hid_p - hid), (0, cout_p - cout))).astype(dt)
    b2p = jnp.pad(b2, (0, cout_p - cout)).astype(dt).reshape(1, cout_p)
    return w1p, b1p, w2p, b2p


# ----------------------------------------------------------------------------
# Forward wrapper
# ----------------------------------------------------------------------------
def mlp_pallas(x, w1p, b1p, w2p, b2p, *, out_features,
               tile_m=512, tile_h_target=512,
               vmem_limit_bytes=None, out_dtype=None):
    """Fused MLP forward: x @ W1 + b1 -> exact GELU -> @ W2 + b2.

    x: (..., Cin) channels-last.  w1p/b1p/w2p/b2p come from prepare_mlp_params
    (Hid/Cout already padded to 128 multiples, already in the compute dtype).
    """
    orig_shape = x.shape
    cin = orig_shape[-1]
    hid_p = w1p.shape[1]
    cout_p = w2p.shape[1]
    assert w1p.shape[0] == cin
    mxu_dtype = w1p.dtype
    out_dtype = out_dtype if out_dtype is not None else x.dtype

    x2d = x.reshape(-1, cin)
    m = x2d.shape[0]

    itemsize_w = jnp.dtype(mxu_dtype).itemsize
    weight_bytes = (w1p.size + w2p.size + b1p.size + b2p.size) * itemsize_w

    # --- weight residency decision (weights dominate the VMEM budget) -------
    # Default scoped VMEM: 16 MiB (v5e) / 32 MiB (v6e, v7x).  Be conservative
    # unless the caller raises vmem_limit_bytes explicitly.
    budget = vmem_limit_bytes if vmem_limit_bytes is not None else (16 << 20)
    use_resident = 2 * weight_bytes <= max(budget - (6 << 20), 0)

    # --- row tiling ----------------------------------------------------------
    # bf16 sublane packing is (16,128); f32 is (8,128).
    sub = 16 if jnp.dtype(x.dtype).itemsize <= 2 else 8
    tm = tile_m
    if use_resident and m >= 512:
        # Prefer >=2 row tiles so megacore / both v7x TensorCores get work.
        tm = min(tm, _round_up((m + 1) // 2, sub))
    tm = max(sub, min(tm, _round_up(m, sub)))
    tm = _round_up(tm, sub)
    m_p = _round_up(m, tm)
    if m_p != m:
        x2d = jnp.pad(x2d, ((0, m_p - m), (0, 0)))
    n_row_tiles = m_p // tm

    x_bytes = m_p * cin * jnp.dtype(x.dtype).itemsize
    out_bytes = m_p * cout_p * jnp.dtype(out_dtype).itemsize
    flops = 2 * m_p * (cin * hid_p + hid_p * cout_p)

    if use_resident:
        cost = pl.CostEstimate(
            flops=flops, transcendentals=m_p * hid_p,
            bytes_accessed=x_bytes + weight_bytes + out_bytes)
        out2d = pl.pallas_call(
            partial(_mlp_kernel_resident, mxu_dtype=mxu_dtype),
            out_shape=jax.ShapeDtypeStruct((m_p, cout_p), out_dtype),
            grid_spec=pltpu.PrefetchScalarGridSpec(
                num_scalar_prefetch=0,
                grid=(n_row_tiles,),
                in_specs=[
                    pl.BlockSpec((tm, cin), lambda i: (i, 0)),       # x row tile
                    pl.BlockSpec((cin, hid_p), lambda i: (0, 0)),    # W1 (resident)
                    pl.BlockSpec((1, hid_p), lambda i: (0, 0)),      # b1 (resident)
                    pl.BlockSpec((hid_p, cout_p), lambda i: (0, 0)),  # W2 (resident)
                    pl.BlockSpec((1, cout_p), lambda i: (0, 0)),     # b2 (resident)
                ],
                out_specs=pl.BlockSpec((tm, cout_p), lambda i: (i, 0)),
            ),
            compiler_params=pltpu.CompilerParams(
                dimension_semantics=("parallel",),
                vmem_limit_bytes=vmem_limit_bytes),
            cost_estimate=cost,
        )(x2d, w1p, b1p, w2p, b2p)
    else:
        # Streamed fallback: chunk the hidden dim, weights re-read per row tile
        # (tile_m kept large to minimize re-streams).
        n128 = hid_p // 128
        tile_h = 128
        for d in range(1, n128 + 1):
            if n128 % d == 0 and d * 128 <= max(tile_h_target, 128):
                tile_h = d * 128
        n_k = hid_p // tile_h

        cost = pl.CostEstimate(
            flops=flops, transcendentals=m_p * hid_p,
            bytes_accessed=x_bytes + n_row_tiles * weight_bytes + out_bytes)

        f32_out = jnp.dtype(out_dtype) == jnp.dtype(jnp.float32)
        if f32_out:
            kernel = partial(_mlp_kernel_streamed_f32out, mxu_dtype=mxu_dtype)
            scratch = []
        else:
            kernel = partial(_mlp_kernel_streamed_acc, mxu_dtype=mxu_dtype)
            scratch = [pltpu.VMEM((tm, cout_p), jnp.float32)]

        out2d = pl.pallas_call(
            kernel,
            out_shape=jax.ShapeDtypeStruct((m_p, cout_p), out_dtype),
            grid_spec=pltpu.PrefetchScalarGridSpec(
                num_scalar_prefetch=0,
                grid=(n_row_tiles, n_k),
                in_specs=[
                    pl.BlockSpec((tm, cin), lambda i, k: (i, 0)),       # x row tile
                    pl.BlockSpec((cin, tile_h), lambda i, k: (0, k)),   # W1 col-chunk
                    pl.BlockSpec((1, tile_h), lambda i, k: (0, k)),     # b1 chunk
                    pl.BlockSpec((tile_h, cout_p), lambda i, k: (k, 0)),  # W2 row-chunk
                    pl.BlockSpec((1, cout_p), lambda i, k: (0, 0)),     # b2 (full)
                ],
                out_specs=pl.BlockSpec((tm, cout_p), lambda i, k: (i, 0)),
                scratch_shapes=scratch,
            ),
            compiler_params=pltpu.CompilerParams(
                dimension_semantics=("parallel", "arbitrary"),
                vmem_limit_bytes=vmem_limit_bytes),
            cost_estimate=cost,
        )(x2d, w1p, b1p, w2p, b2p)

    return out2d[:m, :out_features].reshape(*orig_shape[:-1], out_features)


# ----------------------------------------------------------------------------
# Reference + synthetic parameters
# ----------------------------------------------------------------------------
def _init_params(key, in_features, hidden_features, out_features,
                 dtype=jnp.float32):
    """Deterministic synthetic parameters (torch nn.Linear init, stored transposed)."""
    k1, k2, k3, k4 = jax.random.split(key, 4)
    bound1 = 1.0 / math.sqrt(in_features)
    bound2 = 1.0 / math.sqrt(hidden_features)
    w1 = jax.random.uniform(k1, (in_features, hidden_features), dtype, -bound1, bound1)
    b1 = jax.random.uniform(k2, (hidden_features,), dtype, -bound1, bound1)
    w2 = jax.random.uniform(k3, (hidden_features, out_features), dtype, -bound2, bound2)
    b2 = jax.random.uniform(k4, (out_features,), dtype, -bound2, bound2)
    return w1, b1, w2, b2


def _mlp_reference(x, w1, b1, w2, b2):
    """Plain-JAX f32 reference of the same forward pass."""
    h = jnp.einsum("...i,ih->...h", x, w1) + b1
    h = _gelu_exact_f32(h)
    return jnp.einsum("...h,ho->...o", h, w2) + b2


if __name__ == "__main__":
    # Small video-shaped input, channels-last: (B, T, H, W, C), VMamba-like C.
    B, T, H, W = 2, 4, 8, 8
    in_features = 96
    hidden_features = 4 * in_features   # 384 (mlp_ratio = 4)
    out_features = in_features          # module default: out = in

    key = jax.random.PRNGKey(0)
    kx, kp = jax.random.split(key)
    x = jax.random.normal(kx, (B, T, H, W, in_features), dtype=jnp.float32)
    w1, b1, w2, b2 = _init_params(kp, in_features, hidden_features, out_features)
    ref = _mlp_reference(x, w1, b1, w2, b2)

    # ---- f32 exact path (matches PyTorch module dtype) ----------------------
    params_f32 = prepare_mlp_params(w1, b1, w2, b2)          # one-time prep
    fwd_f32 = jax.jit(partial(mlp_pallas, out_features=out_features))
    out = jax.block_until_ready(fwd_f32(x, *params_f32))
    assert out.shape == (B, T, H, W, out_features)
    assert jnp.allclose(out, ref, atol=1e-4, rtol=1e-4), "f32 mismatch vs reference"

    # ---- bf16-operand path on an f32 model (v6e/v7x MXU fast path) ----------
    params_bf16 = prepare_mlp_params(w1, b1, w2, b2, compute_dtype=jnp.bfloat16)
    out_mx = jax.block_until_ready(fwd_f32(x, *params_bf16))   # f32 x, bf16 MXU ops
    assert out_mx.shape == (B, T, H, W, out_features)
    assert jnp.allclose(out_mx, ref, atol=5e-2, rtol=5e-2), \
        "bf16-MXU mismatch vs reference"

    # ---- full bf16 path ------------------------------------------------------
    xb = x.astype(jnp.bfloat16)
    outb = jax.block_until_ready(fwd_f32(xb, *params_bf16))
    assert outb.shape == (B, T, H, W, out_features)
    assert jnp.allclose(outb.astype(jnp.float32), ref, atol=5e-2, rtol=5e-2), \
        "bf16 mismatch vs reference"

    # ---- small ragged row count (exercises row padding, tile_m clamping) ----
    x_small = jax.random.normal(kx, (3, 5, in_features), dtype=jnp.float32)
    ref_small = _mlp_reference(x_small, w1, b1, w2, b2)
    out_small = jax.block_until_ready(fwd_f32(x_small, *params_f32))
    assert out_small.shape == (3, 5, out_features)
    assert jnp.allclose(out_small, ref_small, atol=1e-4, rtol=1e-4), \
        "ragged-row mismatch vs reference"

    # TODO(synk): channels_first=True (Linear2d / conv2d) variant and Dropout
    # with p > 0 (training-mode RNG masking) are not implemented; the module's
    # default configuration (channels_last, drop=0.0) is fully covered.
    print("KERNEL_OK")
</pallas_src>

<mosaic_0001>
module attributes {stable_mosaic.version = 11 : i64} {
  func.func @_mlp_kernel_resident(%arg0: i32, %arg1: memref<256x96xf32, #tpu.memory_space<vmem>>, %arg2: memref<96x384xf32, #tpu.memory_space<vmem>>, %arg3: memref<1x384xf32, #tpu.memory_space<vmem>>, %arg4: memref<384x128xf32, #tpu.memory_space<vmem>>, %arg5: memref<1x128xf32, #tpu.memory_space<vmem>>, %arg6: memref<256x128xf32, #tpu.memory_space<vmem>>) attributes {dimension_semantics = [#tpu.dimension_semantics<parallel>], iteration_bounds = array<i64: 2>, scalar_prefetch = 0 : i64, scratch_operands = 0 : i64, tpu.core_type = #tpu.core_type<tc>, window_params = [{transform_indices = @transform_0, window_bounds = array<i64: 256, 96>}, {pipeline_mode = #tpu.pipeline_mode<synchronous>, transform_indices = @transform_1, window_bounds = array<i64: 96, 384>}, {pipeline_mode = #tpu.pipeline_mode<synchronous>, transform_indices = @transform_2, window_bounds = array<i64: 1, 384>}, {pipeline_mode = #tpu.pipeline_mode<synchronous>, transform_indices = @transform_3, window_bounds = array<i64: 384, 128>}, {pipeline_mode = #tpu.pipeline_mode<synchronous>, transform_indices = @transform_4, window_bounds = array<i64: 1, 128>}, {transform_indices = @transform_5, window_bounds = array<i64: 256, 128>}]} {
    %c0 = arith.constant 0 : index
    %c0_0 = arith.constant 0 : index
    %0 = vector.load %arg1[%c0, %c0_0] : memref<256x96xf32, #tpu.memory_space<vmem>>, vector<256x96xf32>
    %c0_1 = arith.constant 0 : index
    %c0_2 = arith.constant 0 : index
    %1 = vector.load %arg2[%c0_1, %c0_2] : memref<96x384xf32, #tpu.memory_space<vmem>>, vector<96x384xf32>
    %cst = arith.constant dense<0.000000e+00> : vector<256x384xf32>
    %2 = tpu.matmul %0, %1, %cst {dimension_numbers = #tpu.dot_dimension_numbers<[1], [0], [0], [1], [0, 0, 1, 1], [], []>} : vector<256x96xf32>, vector<96x384xf32>, vector<256x384xf32> -> vector<256x384xf32>
    %c0_3 = arith.constant 0 : index
    %c0_4 = arith.constant 0 : index
    %3 = vector.load %arg3[%c0_3, %c0_4] : memref<1x384xf32, #tpu.memory_space<vmem>>, vector<1x384xf32>
    %4 = vector.broadcast %3 : vector<1x384xf32> to vector<256x384xf32>
    %5 = arith.addf %2, %4 : vector<256x384xf32>
    %cst_5 = arith.constant 5.000000e-01 : f32
    %6 = vector.broadcast %cst_5 : f32 to vector<256x384xf32>
    %7 = arith.mulf %6, %5 : vector<256x384xf32>
    %cst_6 = arith.constant 0.707106769 : f32
    %8 = vector.broadcast %cst_6 : f32 to vector<256x384xf32>
    %9 = arith.mulf %5, %8 : vector<256x384xf32>
    %10 = math.erf %9 : vector<256x384xf32>
    %cst_7 = arith.constant 1.000000e+00 : f32
    %11 = vector.broadcast %cst_7 : f32 to vector<256x384xf32>
    %12 = arith.addf %11, %10 : vector<256x384xf32>
    %13 = arith.mulf %7, %12 : vector<256x384xf32>
    %c0_8 = arith.constant 0 : index
    %c0_9 = arith.constant 0 : index
    %14 = vector.load %arg4[%c0_8, %c0_9] : memref<384x128xf32, #tpu.memory_space<vmem>>, vector<384x128xf32>
    %cst_10 = arith.constant dense<0.000000e+00> : vector<256x128xf32>
    %15 = tpu.matmul %13, %14, %cst_10 {dimension_numbers = #tpu.dot_dimension_numbers<[1], [0], [0], [1], [0, 0, 1, 1], [], []>} : vector<256x384xf32>, vector<384x128xf32>, vector<256x128xf32> -> vector<256x128xf32>
    %c0_11 = arith.constant 0 : index
    %c0_12 = arith.constant 0 : index
    %16 = vector.load %arg5[%c0_11, %c0_12] : memref<1x128xf32, #tpu.memory_space<vmem>>, vector<1x128xf32>
    %17 = vector.broadcast %16 : vector<1x128xf32> to vector<256x128xf32>
    %18 = arith.addf %15, %17 : vector<256x128xf32>
    %c0_13 = arith.constant 0 : index
    %c0_14 = arith.constant 0 : index
    %19 = vector.load %arg6[%c0_13, %c0_14] : memref<256x128xf32, #tpu.memory_space<vmem>>, vector<256x128xf32>
    tpu.vector_store %arg6[%c0_13, %c0_14], %18 {strides = array<i32>} : memref<256x128xf32, #tpu.memory_space<vmem>>, vector<256x128xf32>,
    return
  }
  func.func @transform_0(%arg0: i32) -> (i32, i32) {
    %c0_i32 = arith.constant 0 : i32
    %c0_i32_0 = arith.constant 0 : i32
    return %arg0, %c0_i32 : i32, i32
  }
  func.func @transform_1(%arg0: i32) -> (i32, i32) {
    %c0_i32 = arith.constant 0 : i32
    %c0_i32_0 = arith.constant 0 : i32
    %c0_i32_1 = arith.constant 0 : i32
    return %c0_i32, %c0_i32_0 : i32, i32
  }
  func.func @transform_2(%arg0: i32) -> (i32, i32) {
    %c0_i32 = arith.constant 0 : i32
    %c0_i32_0 = arith.constant 0 : i32
    %c0_i32_1 = arith.constant 0 : i32
    return %c0_i32, %c0_i32_0 : i32, i32
  }
  func.func @transform_3(%arg0: i32) -> (i32, i32) {
    %c0_i32 = arith.constant 0 : i32
    %c0_i32_0 = arith.constant 0 : i32
    %c0_i32_1 = arith.constant 0 : i32
    return %c0_i32, %c0_i32_0 : i32, i32
  }
  func.func @transform_4(%arg0: i32) -> (i32, i32) {
    %c0_i32 = arith.constant 0 : i32
    %c0_i32_0 = arith.constant 0 : i32
    %c0_i32_1 = arith.constant 0 : i32
    return %c0_i32, %c0_i32_0 : i32, i32
  }
  func.func @transform_5(%arg0: i32) -> (i32, i32) {
    %c0_i32 = arith.constant 0 : i32
    %c0_i32_0 = arith.constant 0 : i32
    return %arg0, %c0_i32 : i32, i32
  }
}

</mosaic_0001>

<bundles_post_ra>
// kernel: mlp_pallas.1
= control target key start
LH: loop header
LB: loop body
LE: loop exit
PB: predicated region body
PF: predicated region fallthrough
CT: control target
= control target key end

     0   :  { %10 = vsyncpa [#allocation3], 0  ;;  %s3981_s0 = inlined_call_operand.hbm [shape: f32[512,96], index: 0, kind: input, shape index: {}]   ;;  %s3982_s1 = inlined_call_operand.hbm [shape: f32[96,384], index: 1, kind: input, shape index: {}]   ;;  %s3983_s2 = inlined_call_operand.vmem [shape: f32[1,384], index: 2, kind: input, shape index: {}]   ;;  %s3984_s3 = inlined_call_operand.hbm [shape: f32[384,128], index: 3, kind: input, shape index: {}]   ;;  %s3985_s4 = inlined_call_operand.vmem [shape: f32[1,128], index: 4, kind: input, shape index: {}]   ;;  %s3986_s5 = inlined_call_operand.hbm [shape: f32[512,128], index: 5, kind: output, shape index: {}]  }
   0x1   :  { %12 = vsyncpa [#allocation3 + $0x1], 0 }
   0x2   :  { %13 = vsyncpa [#allocation6], 0 }
   0x3   :  { %14 = vsyncpa [#allocation4], 0 }
   0x4   :  { %16 = vsyncpa [#allocation4 + $0x1], 0  ;;  %s2847_s18 = smov 0   ;;  %s2849_s19 = smov 0  }
   0x5   :  { %s2851_s20 = smov 0   ;;  %s2853_s21 = smov 0  }
   0x6 LB: > { %s2868_s22 = sadd.s32 4294967295, %s2804_s21   ;;  %s2061_s23 = sadd.s32 4294967294, %s2804_s21   ;;  %s2804_s21 = sphi %s2853_s21, %s4010_s21   ;;  %s2800_s20 = sphi %s2851_s20, %s4009_s20   ;;  %s2796_s19 = sphi %s2849_s19, %s4008_s19   ;;  %s2792_s18 = sphi %s2847_s18, %s4007_s18  }
   0x7   : > { %p42_p0 = scmp.ne.s32.totalorder %s2796_s19, %s2792_s18  ;;  %p3987_p1 = scmp.eq.s32.totalorder %s2868_s22, 0 }
   0x8   : > { %p156_p3 = scmp.eq.s32.totalorder %s2061_s23, 1  ;;  %p2062_p5 = scmp.ge.s32.totalorder %s2804_s21, 1 }
   0x9   : > { %p2877_p4 = por %p3987_p1, %p42_p0  ;;  %p163_p7 = scmp.lt.s32.totalorder %s2804_s21, 3 }
   0xa   : > { %p2882_p6 = por %p156_p3, %p42_p0  ;;  %s2806_s27 = smov [#allocation5]  }
   0xb   : > { %s3992_s24 = scalar_select %p2877_p4, 1, 0 }
   0xc   : > { %s3993_s25 = scalar_select %p2882_p6, 1, 0 }
   0xd   : > { %p2887_p8 = pnand %p2062_p5, %p163_p7  ;;  %s175_s28 = sshll.u32 %s2806_s27, 4  ;;  %s176_s28 = int_to_ptr.vmem [resolvable:$true] %s175_s28 }
   0xe   : > { %s2807_s30 = smov [#allocation7]   ;;  %s2667_s7 = scalar_lea.vmem %s176_s28, 4608 }
   0xf   : > { %s3994_s26 = scalar_select %p2887_p8, 1, 0 }
  0x10   : > { %p2402_p9 = pneg %p2887_p8  ;;  %s191_s6 = sshll.u32 %s2807_s30, 4  ;;  %s192_s6 = int_to_ptr.vmem [resolvable:$true] %s191_s6 }
  0x11   : > { %p2668_p13 = scmp.ne.s32.totalorder %s176_s28, %s2667_s7  ;;  %p2675_p5 = scmp.lt.s32.totalorder %s176_s28, %s176_s28 }
  0x12   : > { %p2896_p11 = pnand %p2402_p9, %p3987_p1  ;;  %p2676_p7 = scmp.lt.s32.totalorder %s2667_s7, %s2667_s7 }
  0x14   : > { %p2658_p12 = pneg %p2896_p11  ;;  %p2677_p10 = por %p2676_p7, %p2675_p5 }
  0x16   : > { %p2670_p0 = pnand %p2668_p13, %p2658_p12 }
  0x18   : > { %p2671_p3 = pneg %p2670_p0 }
  0x1a   : > { %p2678_p9 = pnand %p2677_p10, %p2671_p3 }
  0x1c   : > { %2681 = shalt.err (!%p2678_p9)
}
  0x1d   : > { %s2808_s8 = smov 384   ;;  %s2809_s9 = smov 24  }
  0x1e   : > { %2405 = dma.hbm_to_vmem [thread:$0]  (!%p2896_p11), %s3982_s1, 4608, %s176_s28, [#allocation6], %s2808_s8, %s2808_s8, %s2809_s9  }
  0x1f   : > { %s2693_s12 = scalar_lea.vmem %s192_s6, 6144  ;;  %p2701_p2 = scmp.lt.s32.totalorder %s192_s6, %s192_s6 }
  0x20   : > { %p2694_p1 = scmp.ne.s32.totalorder %s192_s6, %s2693_s12  ;;  %p2702_p6 = scmp.lt.s32.totalorder %s2693_s12, %s2693_s12 }
  0x22   : > { %p2696_p13 = pnand %p2694_p1, %p2658_p12  ;;  %p2703_p5 = por %p2702_p6, %p2701_p2 }
  0x24   : > { %p2697_p0 = pneg %p2696_p13 }
  0x26   : > { %p2704_p10 = pnand %p2703_p5, %p2697_p0 }
  0x28   : > { %2707 = shalt.err (!%p2704_p10)
}
  0x29   : > { %s3988_s13 = smov 128   ;;  %s2811_s14 = smov 8  }
  0x2a   : > { %2408 = dma.hbm_to_vmem [thread:$0]  (!%p2896_p11), %s3984_s3, 6144, %s192_s6, [#allocation6], %s3988_s13, %s3988_s13, %s2811_s14  }
  0x2b   : > { %s2922_s17 = sadd.s32 1, %s2804_s21   ;;  %s29_s27 = sadd.s32 1, %s2800_s20 }
  0x2c   : > { %s26_s23 = ssub.s32 %s2804_s21, %s2922_s17  ;;  %p36_p2 = scmp.ne.s32.totalorder %s2800_s20, %s2796_s19 }
  0x2d   : > { %p27_p1 = scmp.eq.s32.totalorder %s26_s23, 0  ;;  %p37_p6 = scmp.eq.s32.totalorder %s2804_s21, 0 }
  0x2e   : > { %p3996_p3 = scmp.eq.s32.totalorder %s2868_s22, 1  ;;  %p2419_p9 = scmp.lt.s32.totalorder %s2804_s21, 2 }
  0x2f   : > { %s2931_s28 = scalar_select %p27_p1, %s2800_s20, %s29_s27  }
  0x30   : > { %p38_p12 = por %p37_p6, %p36_p2  ;;  %p2935_p7 = por %p3996_p3, %p36_p2 }
  0x31   : > { %s208_s30 = sand.u32 1, %s2800_s20   ;;  %s2144_s6 = sshll.u32 %s2804_s21, 12 }
  0x32   : > { %s3997_s29 = scalar_select %p2935_p7, 1, 0 }
  0x33   : > { %s2066_s7 = sshll.u32 %s208_s30, 8  ;;  %s2945_s10 = scalar_lea.hbm %s3981_s0, %s2144_s6 }
  0x34   : > { %s212_s11 = scalar_lea.vmem [#allocation2], %s2066_s7  ;;  %p2949_p11 = pnand %p2419_p9, %p38_p12 }
  0x35   : > { %s219_s12 = sshll.u32 %s212_s11, 4  ;;  %s2953_s16 = scalar_lea.sflag [#allocation3], %s208_s30  ;;  %s2947_s12 = int_to_ptr.vmem [resolvable:$true] %s219_s12 }
  0x36   : > { %s2708_s23 = scalar_lea.hbm %s2945_s10, 4096  ;;  %p2710_p0 = pneg %p2949_p11 }
  0x37   : > { %p2709_p13 = scmp.ne.s32.totalorder %s2945_s10, %s2708_s23  ;;  %s2713_s7 = scalar_lea.hbm %s3981_s0, 8192 }
  0x38   : > { %p2714_p1 = scmp.lt.s32.totalorder %s2945_s10, %s3981_s0  ;;  %p2715_p2 = scmp.lt.s32.totalorder %s2713_s7, %s2708_s23 }
  0x39   : > { %p2711_p5 = pnand %p2710_p0, %p2709_p13 }
  0x3a   : > { %p2716_p6 = por %p2715_p2, %p2714_p1 }
  0x3b   : > { %p2712_p10 = pneg %p2711_p5 }
  0x3d   : > { %p2717_p12 = pnand %p2716_p6, %p2712_p10 }
  0x3f   : > { %2720 = shalt.err (!%p2717_p12)
}
  0x40   : > { %s2721_s30 = scalar_lea.vmem %s2947_s12, 4096  ;;  %s2812_s11 = smov [#allocation2]  }
  0x41   : > { %p2722_p3 = scmp.ne.s32.totalorder %s2947_s12, %s2721_s30  ;;  %s2726_s13 = sshll.u32 %s2812_s11, 4  ;;  %s2727_s13 = int_to_ptr.vmem [resolvable:$false] %s2726_s13 }
  0x42   : > { %s2728_s27 = scalar_lea.vmem %s2727_s13, 8192  ;;  %p2729_p5 = scmp.lt.s32.totalorder %s2947_s12, %s2727_s13 }
  0x43   : > { %p2724_p9 = pnand %p2722_p3, %p2710_p0  ;;  %p2730_p7 = scmp.lt.s32.totalorder %s2728_s27, %s2721_s30 }
  0x45   : > { %p2725_p13 = pneg %p2724_p9  ;;  %p2731_p4 = por %p2730_p7, %p2729_p5 }
  0x47   : > { %p2732_p8 = pnand %p2731_p4, %p2725_p13 }
  0x49   : > { %2735 = shalt.err (!%p2732_p8)
}
  0x4a   : > { %s3999_s23 = smov 128   ;;  %p4000_p0 = scmp.ne.s32.totalorder %s3994_s26, 0 }
  0x4b   : > { %2412 = dma.hbm_to_vmem [thread:$0]  (!%p2949_p11), %s2945_s10, 4096, %s2947_s12, %s2953_s16, %s3999_s23, %s3999_s23, %s2811_s14  }
  0x4c   : > { %231 = sbr.rel (%p4000_p0) target bundleno = 678 (0x2a6), region = 40  ;;  %s2980_s6 = sand.u32 (!%p4000_p0), 1, %s2796_s19  }
  0x4d   : > { %s2070_s13 = sshll.u32 (!%p4000_p0), %s2980_s6, 8  ;;  %s234_s7 = scalar_lea.sflag (!%p4000_p0), [#allocation3], %s2980_s6 }
  0x4e   : > { %s2986_s15 = scalar_lea.vmem (!%p4000_p0), [#allocation2], %s2070_s13  ;;  %p4001_p4 = scmp.ne.s32.totalorder (!%p4000_p0), %s3992_s24, 0 }
  0x51   : > { %2779 = dma.done.wait (%p4001_p4), %s234_s7, 4096  }
  0x52   : > { %2781 = vsyncadd (%p4001_p4), %s234_s7, 4294963200  ;;  %p4002_p8 = scmp.eq.s32.totalorder %s2868_s22, 0 }
  0x54   : > { %2783 = dma.done.wait (%p4002_p8), [#allocation6], 10752   ;;  %p4003_p7 = pmov %p4002_p8 }
  0x55   : > { %v2813_v0 = vmov 0.0   ;;  %v340_v1 = vld [vmem:[#allocation5 + $0x110] sm:$0xff]  ;;  %v341_v2 = vld [vmem:[#allocation5 + $0x118] sm:$0xff]  ;;  %v339_v3 = vld [vmem:[#allocation5 + $0x108] sm:$0xff]  ;;  %vm359_vm0 = vcmask 785408   ;;  %s3866_s12 = scalar_lea.vmem [#allocation8], %s2070_s13 }
  0x56   : > { %2785 = vsyncadd (%p4003_p7), [#allocation6], 4294956544  ;;  %520 = vmatprep.mubr.f32.mxu0 %v2813_v0  ;;  %464 = vmatprep.subr.mxu0 %v340_v1  ;;  %v337_v4 = vld [vmem:[#allocation5 + $0xf8] sm:$0xff]  ;;  %v338_v5 = vld [vmem:[#allocation5 + $0x100] sm:$0xff]  ;;  %s2145_s16 = sshll.u32 %s2868_s22, 12  ;;  %s1969_s8 = sshll.u32 %s3866_s12, 4  ;;  %s3937_s8 = int_to_ptr.vmem [resolvable:$true] %s1969_s8 }
  0x57   : > { %2238 = vmatprep.subr.mxu1 %v341_v2  ;;  %v336_v6 = vld [vmem:[#allocation5 + $0xf0] sm:$0xff]  ;;  %465 = vmatpush1.msra.mxu0 %v339_v3  ;;  %v334_v7 = vld [vmem:[#allocation5 + $0xe0] sm:$0xff]  ;;  %v335_v8 = vld [vmem:[#allocation5 + $0xe8] sm:$0xff]  ;;  %s3935_s11 = scalar_lea.hbm %s3986_s5, %s2145_s16  ;;  %s1956_s27 = scalar_lea.sflag [#allocation4], %s2980_s6 }
  0x58   : > { %2239 = vmatpush3.msra.mxu1 %v341_v2  ;;  %466 = vmatprep.subr.mxu0 %v337_v4  ;;  %v333_v9 = vld [vmem:[#allocation5 + $0xd8] sm:$0xff]  ;;  %v331_v10 = vld [vmem:[#allocation5 + $0xc8] sm:$0xff]  ;;  %v332_v11 = vld [vmem:[#allocation5 + $0xd0] sm:$0xff]  ;;  %s2736_s22 = scalar_lea.vmem %s3937_s8, 4096  ;;  %p4004_p10 = scmp.ne.s32.totalorder %s3997_s29, 0 }
  0x59   : > { %2240 = vmatprep.subr.mxu1 %v338_v5  ;;  %467 = vmatpush1.msra.mxu0 %v336_v6  ;;  %v330_v12 = vld [vmem:[#allocation5 + $0xc0] sm:$0xff]  ;;  %v328_v13 = vld [vmem:[#allocation5 + $0xb0] sm:$0xff]  ;;  %v329_v14 = vld [vmem:[#allocation5 + $0xb8] sm:$0xff]  ;;  %p2737_p11 = scmp.ne.s32.totalorder %s3937_s8, %s2736_s22  ;;  %s2814_s23 = smov [#allocation8]  }
  0x5a   : > { %2241 = vmatpush3.msra.mxu1 %v338_v5  ;;  %468 = vmatprep.subr.mxu0 %v334_v7  ;;  %v327_v15 = vld [vmem:[#allocation5 + $0xa8] sm:$0xff]  ;;  %v325_v16 = vld [vmem:[#allocation5 + $0x98] sm:$0xff]  ;;  %v326_v17 = vld [vmem:[#allocation5 + $0xa0] sm:$0xff]  ;;  %s2740_s13 = sshll.u32 %s2814_s23, 4  ;;  %s2741_s13 = int_to_ptr.vmem [resolvable:$false] %s2740_s13 }
  0x5b   : > { %2242 = vmatprep.subr.mxu1 %v335_v8  ;;  %469 = vmatpush1.msra.mxu0 %v333_v9  ;;  %v324_v18 = vld [vmem:[#allocation5 + $0x90] sm:$0xff]  ;;  %v322_v19 = vld [vmem:[#allocation5 + $0x80] sm:$0xff]  ;;  %v323_v20 = vld [vmem:[#allocation5 + $0x88] sm:$0xff]  ;;  %p2738_p1 = pnand %p2737_p11, %p4004_p10  ;;  %s2742_s7 = scalar_lea.vmem %s2741_s13, 8192 }
  0x5c   : > { %2243 = vmatpush3.msra.mxu1 %v335_v8  ;;  %470 = vmatprep.subr.mxu0 %v331_v10  ;;  %v321_v21 = vld [vmem:[#allocation5 + $0x78] sm:$0xff]  ;;  %v319_v22 = vld [vmem:[#allocation5 + $0x68] sm:$0xff]  ;;  %v320_v23 = vld [vmem:[#allocation5 + $0x70] sm:$0xff]  ;;  %p2743_p6 = scmp.lt.s32.totalorder %s3937_s8, %s2741_s13  ;;  %p2744_p12 = scmp.lt.s32.totalorder %s2742_s7, %s2736_s22 }
  0x5d   : > { %2244 = vmatprep.subr.mxu1 %v332_v11  ;;  %471 = vmatpush1.msra.mxu0 %v330_v12  ;;  %v318_v24 = vld [vmem:[#allocation5 + $0x60] sm:$0xff]  ;;  %v316_v25 = vld [vmem:[#allocation5 + $0x50] sm:$0xff]  ;;  %v317_v26 = vld [vmem:[#allocation5 + $0x58] sm:$0xff]  ;;  %p2739_p2 = pneg %p2738_p1 }
  0x5e   : > { %2245 = vmatpush3.msra.mxu1 %v332_v11  ;;  %472 = vmatprep.subr.mxu0 %v328_v13  ;;  %v315_v27 = vld [vmem:[#allocation5 + $0x48] sm:$0xff]  ;;  %v313_v28 = vld [vmem:[#allocation5 + $0x38] sm:$0xff]  ;;  %v314_v29 = vld [vmem:[#allocation5 + $0x40] sm:$0xff]  ;;  %p2745_p3 = por %p2744_p12, %p2743_p6 }
  0x5f   : > { %2246 = vmatprep.subr.mxu1 %v329_v14  ;;  %473 = vmatpush1.msra.mxu0 %v327_v15  ;;  %v312_v30 = vld [vmem:[#allocation5 + $0x30] sm:$0xff]  ;;  %v310_v31 = vld [vmem:[#allocation5 + $0x20] sm:$0xff]  ;;  %v311_v32 = vld [vmem:[#allocation5 + $0x28] sm:$0xff] }
  0x60   : > { %2247 = vmatpush3.msra.mxu1 %v329_v14  ;;  %474 = vmatprep.subr.mxu0 %v325_v16  ;;  %v309_v33 = vld [vmem:[#allocation5 + $0x18] sm:$0xff]  ;;  %v307_v34 = vld [vmem:[#allocation5 + $0x8] sm:$0xff]  ;;  %v308_v35 = vld [vmem:[#allocation5 + $0x10] sm:$0xff]  ;;  %p2746_p9 = pnand %p2745_p3, %p2739_p2 }
  0x61   : > { %2248 = vmatprep.subr.mxu1 %v326_v17  ;;  %475 = vmatpush1.msra.mxu0 %v324_v18  ;;  %v306_v36 = vld [vmem:[#allocation5] sm:$0xff]  ;;  %v275_v38 = vld [vmem:[%s2986_s15 + $0x8] sm:$0xff]  ;;  %v276_v39 = vld [vmem:[%s2986_s15 + $0x10] sm:$0xff] }
  0x62   : > { %2249 = vmatpush3.msra.mxu1 %v326_v17  ;;  %476 = vmatprep.subr.mxu0 %v322_v19  ;;  %v274_v37 = vld [vmem:[%s2986_s15] sm:$0xff]  ;;  %v1465_v40 = vld [vmem:[#allocation7 + $0x178] sm:$0xff]  ;;  %v1432_v44 = vld [vmem:[#allocation7 + $0x70] sm:$0xff] }
  0x63   : > { %2250 = vmatprep.subr.mxu1 %v323_v20  ;;  %477 = vmatpush1.msra.mxu0 %v321_v21  ;;  %v1433_v41 = vld [vmem:[#allocation7 + $0x78] sm:$0xff]  ;;  %v278_v43 = vld [vmem:[%s2986_s15 + $0x20] sm:$0xff]  ;;  %v1464_v45 = vld [vmem:[#allocation7 + $0x170] sm:$0xff] }
  0x64   : > { %2251 = vmatpush3.msra.mxu1 %v323_v20  ;;  %478 = vmatprep.subr.mxu0 %v319_v22  ;;  %v277_v42 = vld [vmem:[%s2986_s15 + $0x18] sm:$0xff]  ;;  %v279_v46 = vld [vmem:[%s2986_s15 + $0x28] sm:$0xff]  ;;  %v280_v47 = vld [vmem:[%s2986_s15 + $0x30] sm:$0xff] }
  0x65   : > { %2252 = vmatprep.subr.mxu1 %v320_v23  ;;  %479 = vmatpush1.msra.mxu0 %v318_v24  ;;  %v1431_v48 = vld [vmem:[#allocation7 + $0x68] sm:$0xff]  ;;  %v1430_v49 = vld [vmem:[#allocation7 + $0x60] sm:$0xff]  ;;  %v281_v50 = vld [vmem:[%s2986_s15 + $0x38] sm:$0xff] }
  0x66   : > { %2253 = vmatpush3.msra.mxu1 %v320_v23  ;;  %480 = vmatprep.subr.mxu0 %v316_v25  ;;  %v3022_v51 = vld [vmem:[%s2986_s15 + $0x40] sm:$0xff]  ;;  %v1429_v52 = vld [vmem:[#allocation7 + $0x58] sm:$0xff]  ;;  %v1463_v53 = vld [vmem:[#allocation7 + $0x168] sm:$0xff] }
  0x67   : > { %2254 = vmatprep.subr.mxu1 %v317_v26  ;;  %481 = vmatpush1.msra.mxu0 %v315_v27  ;;  %v3031_v54 = vld [vmem:[%s2986_s15 + $0x48] sm:$0xff]  ;;  %v3035_v55 = vld [vmem:[%s2986_s15 + $0x50] sm:$0xff]  ;;  %v3045_v58 = vld [vmem:[%s2986_s15 + $0x58] sm:$0xff] }
  0x68   : > { %2255 = vmatpush3.msra.mxu1 %v317_v26  ;;  %482 = vmatprep.subr.mxu0 %v313_v28  ;;  %v1428_v56 = vld [vmem:[#allocation7 + $0x50] sm:$0xff]  ;;  %v1427_v57 = vld [vmem:[#allocation7 + $0x48] sm:$0xff]  ;;  %v3048_v59 = vld [vmem:[%s2986_s15 + $0x60] sm:$0xff] }
  0x69   : > { %2256 = vmatprep.subr.mxu1 %v314_v29  ;;  %483 = vmatpush1.msra.mxu0 %v312_v30  ;;  %v1426_v60 = vld [vmem:[#allocation7 + $0x40] sm:$0xff]  ;;  %v3058_v62 = vld [vmem:[%s2986_s15 + $0x68] sm:$0xff]  ;;  %v3062_v63 = vld [vmem:[%s2986_s15 + $0x70] sm:$0xff] }
  0x6a   : > { %2257 = vmatpush3.msra.mxu1 %v314_v29  ;;  %484 = vmatprep.subr.mxu0 %v310_v31  ;;  %v1462_v61 = vld [vmem:[#allocation7 + $0x160] sm:$0xff]  ;;  %v1425_v1 = vld [vmem:[#allocation7 + $0x38] sm:$0xff]  ;;  %v1424_v2 = vld [vmem:[#allocation7 + $0x30] sm:$0xff] }
  0x6b   : > { %2258 = vmatprep.subr.mxu1 %v311_v32  ;;  %485 = vmatpush1.msra.mxu0 %v309_v33  ;;  %v3072_v3 = vld [vmem:[%s2986_s15 + $0x78] sm:$0xff]  ;;  %v3075_v4 = vld [vmem:[%s2986_s15 + $0x80] sm:$0xff]  ;;  %v1423_v5 = vld [vmem:[#allocation7 + $0x28] sm:$0xff] }
  0x6c   : > { %2259 = vmatpush3.msra.mxu1 %v311_v32  ;;  %486 = vmatprep.subr.mxu0 %v307_v34  ;;  %v1461_v6 = vld [vmem:[#allocation7 + $0x158] sm:$0xff]  ;;  %v3085_v7 = vld [vmem:[%s2986_s15 + $0x88] sm:$0xff]  ;;  %v3089_v8 = vld [vmem:[%s2986_s15 + $0x90] sm:$0xff] }
  0x6d   : > { %2260 = vmatprep.subr.mxu1 %v308_v35  ;;  %487 = vmatpush1.msra.mxu0 %v306_v36  ;;  %v1422_v9 = vld [vmem:[#allocation7 + $0x20] sm:$0xff]  ;;  %v1421_v10 = vld [vmem:[#allocation7 + $0x18] sm:$0xff]  ;;  %v1420_v13 = vld [vmem:[#allocation7 + $0x10] sm:$0xff] }
  0x6e   : > { %2261 = vmatpush3.msra.mxu1 %v308_v35  ;;  %2262 = vmatprep.mubr.msk.f32.mxu1 %vm359_vm0, %v274_v37  ;;  %v3100_v11 = vld [vmem:[%s2986_s15 + $0x98] sm:$0xff]  ;;  %v3103_v12 = vld [vmem:[%s2986_s15 + $0xa0] sm:$0xff]  ;;  %v3114_v14 = vld [vmem:[%s2986_s15 + $0xa8] sm:$0xff] }
  0x6f   : > { %2074 = vmatmul.mubr.msk.f32.vlgmr.msra.gmra.mxu0 %vm359_vm0, %v274_v37  ;;  %2263 = vmatmul.mubr.msk.f32.vlgmr.msra.gmra.mxu1 %vm359_vm0, %v275_v38  ;;  %v3118_v15 = vld [vmem:[%s2986_s15 + $0xb0] sm:$0xff]  ;;  %v1419_v16 = vld [vmem:[#allocation7 + $0x8] sm:$0xff]  ;;  %v1418_v17 = vld [vmem:[#allocation7] sm:$0xff] }
  0x70   : > { %526 = vmatprep.mubr.f32.mxu0 %v2813_v0  ;;  %2265 = vmatprep.mubr.msk.f32.mxu1 %vm359_vm0, %v276_v39  ;;  %v3129_v18 = vld [vmem:[%s2986_s15 + $0xb8] sm:$0xff]  ;;  %v3132_v19 = vld [vmem:[%s2986_s15 + $0xc0] sm:$0xff]  ;;  %v3143_v21 = vld [vmem:[%s2986_s15 + $0xc8] sm:$0xff] }
  0x71   : > { %1473 = vmatprep.subr.mxu1 %v2813_v0  ;;  %2310 = vmatprep.subr.mxu0 %v1465_v40  ;;  %v1449_v20 = vld [vmem:[#allocation7 + $0xf8] sm:$0xff]  ;;  %v3147_v22 = vld [vmem:[%s2986_s15 + $0xd0] sm:$0xff]  ;;  %v1447_v24 = vld [vmem:[#allocation7 + $0xe8] sm:$0xff] }
  0x72   : > { %1474 = vmatpush1.msra.mxu1 %v1433_v41  ;;  %2311 = vmatpush3.msra.mxu0 %v1465_v40  ;;  %v1448_v23 = vld [vmem:[#allocation7 + $0xf0] sm:$0xff]  ;;  %v3158_v25 = vld [vmem:[%s2986_s15 + $0xd8] sm:$0xff]  ;;  %v3161_v26 = vld [vmem:[%s2986_s15 + $0xe0] sm:$0xff] }
  0x73   : > { %2075 = vmatmul.mubr.msk.f32.gmra.mxu0 %vm359_vm0, %v275_v38  ;;  %1475 = vmatprep.subr.mxu1 %v2813_v0  ;;  %v3172_v27 = vld [vmem:[%s2986_s15 + $0xe8] sm:$0xff]  ;;  %v3176_v28 = vld [vmem:[%s2986_s15 + $0xf0] sm:$0xff]  ;;  %v3186_v29 = vld [vmem:[%s2986_s15 + $0xf8] sm:$0xff] }
  0x74   : > { %532 = vmatprep.mubr.f32.mxu0 %v2813_v0  ;;  %2266 = vmatmul.mubr.msk.f32.gmra.mxu1 %vm359_vm0, %v277_v42  ;;  %v1446_v30 = vld [vmem:[#allocation7 + $0xe0] sm:$0xff]  ;;  %v1445_v31 = vld [vmem:[#allocation7 + $0xd8] sm:$0xff]  ;;  %v1460_v32 = vld [vmem:[#allocation7 + $0x150] sm:$0xff] }
  0x75   : > { %2268 = vmatprep.mubr.msk.f32.mxu1 %vm359_vm0, %v278_v43  ;;  %1476 = vmatpush1.msra.mxu1 %v1432_v44  ;;  %v1444_v33 = vld [vmem:[#allocation7 + $0xd0] sm:$0xff]  ;;  %v1459_v34 = vld [vmem:[#allocation7 + $0x148] sm:$0xff]  ;;  %v1458_v36 = vld [vmem:[#allocation7 + $0x140] sm:$0xff] }
  0x76   : > { %2312 = vmatprep.subr.mxu0 %v1464_v45  ;;  %1477 = vmatprep.subr.mxu1 %v2813_v0  ;;  %v1443_v35 = vld [vmem:[#allocation7 + $0xc8] sm:$0xff]  ;;  %v1442_v37 = vld [vmem:[#allocation7 + $0xc0] sm:$0xff]  ;;  %v1441_v38 = vld [vmem:[#allocation7 + $0xb8] sm:$0xff] }
  0x77   : > { %2076 = vmatmul.mubr.msk.f32.gmra.mxu0 %vm359_vm0, %v276_v39  ;;  %1478 = vmatpush1.msra.mxu1 %v1431_v48  ;;  %v1457_v39 = vld [vmem:[#allocation7 + $0x138] sm:$0xff]  ;;  %v1440_v40 = vld [vmem:[#allocation7 + $0xb0] sm:$0xff]  ;;  %v1438_v44 = vld [vmem:[#allocation7 + $0xa0] sm:$0xff] }
  0x78   : > { %538 = vmatprep.mubr.f32.mxu0 %v2813_v0  ;;  %2269 = vmatmul.mubr.msk.f32.gmra.mxu1 %vm359_vm0, %v279_v46  ;;  %v1456_v41 = vld [vmem:[#allocation7 + $0x130] sm:$0xff] }
  0x79   : > { %2271 = vmatprep.mubr.msk.f32.mxu1 %vm359_vm0, %v280_v47  ;;  %1479 = vmatprep.subr.mxu1 %v2813_v0  ;;  %v1436_v48 = vld [vmem:[#allocation7 + $0x90] sm:$0xff] }
  0x7a   : > { %2313 = vmatpush3.msra.mxu0 %v1464_v45  ;;  %1480 = vmatpush1.msra.mxu1 %v1430_v49  ;;  %v1454_v45 = vld [vmem:[#allocation7 + $0x120] sm:$0xff]  ;;  %v1452_v49 = vld [vmem:[#allocation7 + $0x110] sm:$0xff] }
  0x7b   : > { %2077 = vmatmul.mubr.msk.f32.gmra.mxu0 %vm359_vm0, %v277_v42  ;;  %1481 = vmatprep.subr.mxu1 %v2813_v0  ;;  %v1439_v42 = vld [vmem:[#allocation7 + $0xa8] sm:$0xff] }
  0x7c   : > { %544 = vmatprep.mubr.f32.mxu0 %v2813_v0  ;;  %2272 = vmatmul.mubr.msk.f32.gmra.mxu1 %vm359_vm0, %v281_v50 }
  0x7d   : > { %2274 = vmatprep.mubr.msk.f32.mxu1 %vm359_vm0, %v3022_v51  ;;  %1482 = vmatpush1.msra.mxu1 %v1429_v52  ;;  %v1434_v52 = vld [vmem:[#allocation7 + $0x80] sm:$0xff] }
  0x7e   : > { %2314 = vmatprep.subr.mxu0 %v1463_v53  ;;  %1483 = vmatprep.subr.mxu1 %v2813_v0 }
  0x7f   : > { %2078 = vmatmul.mubr.msk.f32.gmra.mxu0 %vm359_vm0, %v278_v43  ;;  %1484 = vmatpush1.msra.mxu1 %v1428_v56  ;;  %v1455_v43 = vld [vmem:[#allocation7 + $0x128] sm:$0xff] }
  0x80   : > { %550 = vmatprep.mubr.f32.mxu0 %v2813_v0  ;;  %2275 = vmatmul.mubr.msk.f32.gmra.mxu1 %vm359_vm0, %v3031_v54 }
  0x81   : > { %2277 = vmatprep.mubr.msk.f32.mxu1 %vm359_vm0, %v3035_v55  ;;  %1485 = vmatprep.subr.mxu1 %v2813_v0 }
  0x82   : > { %2315 = vmatpush3.msra.mxu0 %v1463_v53  ;;  %1486 = vmatpush1.msra.mxu1 %v1427_v57  ;;  %v1450_v53 = vld [vmem:[#allocation7 + $0x100] sm:$0xff] }
  0x83   : > { %2079 = vmatmul.mubr.msk.f32.gmra.mxu0 %vm359_vm0, %v279_v46  ;;  %1487 = vmatprep.subr.mxu1 %v2813_v0  ;;  %v1437_v46 = vld [vmem:[#allocation7 + $0x98] sm:$0xff]  ;;  %v342_v57 = vld [vmem:[%s3983_s2] sm:$0x7] }
  0x84   : > { %556 = vmatprep.mubr.f32.mxu0 %v2813_v0  ;;  %2278 = vmatmul.mubr.msk.f32.gmra.mxu1 %vm359_vm0, %v3045_v58 }
  0x85   : > { %2280 = vmatprep.mubr.msk.f32.mxu1 %vm359_vm0, %v3048_v59  ;;  %1488 = vmatpush1.msra.mxu1 %v1426_v60 }
  0x86   : > { %2316 = vmatprep.subr.mxu0 %v1462_v61  ;;  %1489 = vmatprep.subr.mxu1 %v2813_v0 }
  0x87   : > { %2080 = vmatmul.mubr.msk.f32.gmra.mxu0 %vm359_vm0, %v280_v47  ;;  %1490 = vmatpush1.msra.mxu1 %v1425_v1  ;;  %v1453_v47 = vld [vmem:[#allocation7 + $0x118] sm:$0xff] }
  0x88   : > { %562 = vmatprep.mubr.f32.mxu0 %v2813_v0  ;;  %2281 = vmatmul.mubr.msk.f32.gmra.mxu1 %vm359_vm0, %v3058_v62 }
  0x89   : > { %2283 = vmatprep.mubr.msk.f32.mxu1 %vm359_vm0, %v3062_v63  ;;  %1491 = vmatprep.subr.mxu1 %v2813_v0 }
  0x8a   : > { %2317 = vmatpush3.msra.mxu0 %v1462_v61  ;;  %1492 = vmatpush1.msra.mxu1 %v1424_v2 }
  0x8b   : > { %2081 = vmatmul.mubr.msk.f32.gmra.mxu0 %vm359_vm0, %v281_v50  ;;  %1493 = vmatprep.subr.mxu1 %v2813_v0  ;;  %v1435_v50 = vld [vmem:[#allocation7 + $0x88] sm:$0xff] }
  0x8c   : > { %568 = vmatprep.mubr.f32.mxu0 %v2813_v0  ;;  %2284 = vmatmul.mubr.msk.f32.gmra.mxu1 %vm359_vm0, %v3072_v3 }
  0x8d   : > { %2286 = vmatprep.mubr.msk.f32.mxu1 %vm359_vm0, %v3075_v4  ;;  %1494 = vmatpush1.msra.mxu1 %v1423_v5 }
  0x8e   : > { %2318 = vmatprep.subr.mxu0 %v1461_v6  ;;  %1495 = vmatprep.subr.mxu1 %v2813_v0 }
  0x8f   : > { %2082 = vmatmul.mubr.msk.f32.gmra.mxu0 %vm359_vm0, %v3022_v51  ;;  %1496 = vmatpush1.msra.mxu1 %v1422_v9  ;;  %v1451_v51 = vld [vmem:[#allocation7 + $0x108] sm:$0xff] }
  0x90   : > { %574 = vmatprep.mubr.f32.mxu0 %v2813_v0  ;;  %2287 = vmatmul.mubr.msk.f32.gmra.mxu1 %vm359_vm0, %v3085_v7 }
  0x91   : > { %2289 = vmatprep.mubr.msk.f32.mxu1 %vm359_vm0, %v3089_v8  ;;  %1497 = vmatprep.subr.mxu1 %v2813_v0 }
  0x92   : > { %2319 = vmatpush3.msra.mxu0 %v1461_v6  ;;  %1498 = vmatpush1.msra.mxu1 %v1421_v10 }
  0x93   : > { %2083 = vmatmul.mubr.msk.f32.gmra.mxu0 %vm359_vm0, %v3031_v54  ;;  %1499 = vmatprep.subr.mxu1 %v2813_v0  ;;  %v344_v54 = vlaneseq }
  0x94   : > { %580 = vmatprep.mubr.f32.mxu0 %v2813_v0  ;;  %2290 = vmatmul.mubr.msk.f32.gmra.mxu1 %vm359_vm0, %v3100_v11 }
  0x95   : > { %2292 = vmatprep.mubr.msk.f32.mxu1 %vm359_vm0, %v3103_v12  ;;  %1500 = vmatpush1.msra.mxu1 %v1420_v13 }
  0x96   : > { %1501 = vmatprep.subr.mxu1 %v2813_v0  ;;  %2320 = vmatprep.subr.mxu0 %v1460_v32 }
  0x97   : > { %2084 = vmatmul.mubr.msk.f32.gmra.mxu0 %vm359_vm0, %v3035_v55  ;;  %1502 = vmatpush1.msra.mxu1 %v1419_v16  ;;  %v345_v55 = vshrl.u32 %v344_v54, 7 }
  0x98   : > { %586 = vmatprep.mubr.f32.mxu0 %v2813_v0  ;;  %2293 = vmatmul.mubr.msk.f32.gmra.mxu1 %vm359_vm0, %v3114_v14 }
  0x99   : > { %2295 = vmatprep.mubr.msk.f32.mxu1 %vm359_vm0, %v3118_v15  ;;  %1503 = vmatprep.subr.mxu1 %v2813_v0  ;;  %v346_v56 = vsub.s32 0, %v345_v55 }
  0x9a   : > { %1504 = vmatpush1.msra.mxu1 %v1418_v17  ;;  %2321 = vmatpush3.msra.mxu0 %v1460_v32 }
  0x9b   : > { %2085 = vmatmul.mubr.msk.f32.gmra.mxu0 %vm359_vm0, %v3045_v58  ;;  %1505 = vmatprep.subr.mxu1 %v2813_v0  ;;  %v354_v58 = vsub.s32 2, %v345_v55  ;;  %v3255_v60 = vrot.slane %v342_v57, %v346_v56 }
  0x9c   : > { %592 = vmatprep.mubr.f32.mxu0 %v2813_v0  ;;  %2296 = vmatmul.mubr.msk.f32.gmra.mxu1 %vm359_vm0, %v3129_v18 }
  0x9d   : > { %2298 = vmatprep.mubr.msk.f32.mxu1 %vm359_vm0, %v3132_v19  ;;  %1506 = vmatpush2.msra.mxu1 %v1449_v20  ;;  %v3257_v61 = vrot.slane %v342_v57, %v354_v58 }
  0x9e   : > { %1507 = vmatprep.subr.mxu1 %v2813_v0  ;;  %2322 = vmatprep.subr.mxu0 %v1459_v34 }
  0x9f   : > { %2086 = vmatmul.mubr.msk.f32.gmra.mxu0 %vm359_vm0, %v3048_v59  ;;  %1508 = vmatpush2.msra.mxu1 %v1448_v23  ;;  %v350_v59 = vsub.s32 1, %v345_v55 }
  0xa0   : > { %598 = vmatprep.mubr.f32.mxu0 %v2813_v0  ;;  %2299 = vmatmul.mubr.msk.f32.gmra.mxu1 %vm359_vm0, %v3143_v21 }
  0xa1   : > { %2301 = vmatprep.mubr.msk.f32.mxu1 %vm359_vm0, %v3147_v22  ;;  %1509 = vmatprep.subr.mxu1 %v2813_v0 }
  0xa2   : > { %1510 = vmatpush2.msra.mxu1 %v1447_v24  ;;  %2323 = vmatpush3.msra.mxu0 %v1459_v34 }
  0xa3   : > { %2087 = vmatmul.mubr.msk.f32.gmra.mxu0 %vm359_vm0, %v3058_v62  ;;  %1511 = vmatprep.subr.mxu1 %v2813_v0  ;;  %v3259_v62 = vrot.slane %v342_v57, %v350_v59 }
  0xa4   : > { %604 = vmatprep.mubr.f32.mxu0 %v2813_v0  ;;  %2302 = vmatmul.mubr.msk.f32.gmra.mxu1 %vm359_vm0, %v3158_v25 }
  0xa5   : > { %2304 = vmatprep.mubr.msk.f32.mxu1 %vm359_vm0, %v3161_v26  ;;  %1512 = vmatpush2.msra.mxu1 %v1446_v30 }
  0xa6   : > { %1513 = vmatprep.subr.mxu1 %v2813_v0  ;;  %2324 = vmatprep.subr.mxu0 %v1458_v36 }
  0xa7   : > { %2088 = vmatmul.mubr.msk.f32.gmra.mxu0 %vm359_vm0, %v3062_v63  ;;  %1514 = vmatpush2.msra.mxu1 %v1445_v31 }
  0xa8   : > { %610 = vmatprep.mubr.f32.mxu0 %v2813_v0  ;;  %2305 = vmatmul.mubr.msk.f32.gmra.mxu1 %vm359_vm0, %v3172_v27 }
  0xa9   : > { %2307 = vmatprep.mubr.msk.f32.mxu1 %vm359_vm0, %v3176_v28  ;;  %1515 = vmatprep.subr.mxu1 %v2813_v0 }
  0xaa   : > { %1516 = vmatpush2.msra.mxu1 %v1444_v33  ;;  %2325 = vmatpush3.msra.mxu0 %v1458_v36 }
  0xab   : > { %2089 = vmatmul.mubr.msk.f32.gmra.mxu0 %vm359_vm0, %v3072_v3  ;;  %1517 = vmatprep.subr.mxu1 %v2813_v0 }
  0xac   : > { %616 = vmatprep.mubr.f32.mxu0 %v2813_v0  ;;  %2308 = vmatmul.mubr.msk.f32.gmra.mxu1 %vm359_vm0, %v3186_v29 }
  0xad   : > { %1518 = vmatpush2.msra.mxu1 %v1443_v35  ;;  %2326 = vmatprep.subr.mxu0 %v1457_v39 }
  0xae   : > { %1519 = vmatprep.subr.mxu1 %v2813_v0  ;;  %2327 = vmatpush3.msra.mxu0 %v1457_v39 }
  0xaf   : > { %2090 = vmatmul.mubr.msk.f32.gmra.mxu0 %vm359_vm0, %v3075_v4  ;;  %1520 = vmatpush2.msra.mxu1 %v1442_v37 }
  0xb0   : > { %622 = vmatprep.mubr.f32.mxu0 %v2813_v0  ;;  %1521 = vmatprep.subr.mxu1 %v2813_v0 }
  0xb1   : > { %1522 = vmatpush2.msra.mxu1 %v1441_v38  ;;  %2328 = vmatprep.subr.mxu0 %v1456_v41 }
  0xb2   : > { %1523 = vmatprep.subr.mxu1 %v2813_v0  ;;  %2329 = vmatpush3.msra.mxu0 %v1456_v41 }
  0xb3   : > { %2091 = vmatmul.mubr.msk.f32.gmra.mxu0 %vm359_vm0, %v3085_v7  ;;  %1524 = vmatpush2.msra.mxu1 %v1440_v40 }
  0xb4   : > { %628 = vmatprep.mubr.f32.mxu0 %v2813_v0  ;;  %1525 = vmatprep.subr.mxu1 %v2813_v0 }
  0xb5   : > { %1526 = vmatpush2.msra.mxu1 %v1439_v42  ;;  %2330 = vmatprep.subr.mxu0 %v1455_v43 }
  0xb6   : > { %1527 = vmatprep.subr.mxu1 %v2813_v0  ;;  %2331 = vmatpush3.msra.mxu0 %v1455_v43 }
  0xb7   : > { %2092 = vmatmul.mubr.msk.f32.gmra.mxu0 %vm359_vm0, %v3089_v8  ;;  %1528 = vmatpush2.msra.mxu1 %v1438_v44 }
  0xb8   : > { %634 = vmatprep.mubr.f32.mxu0 %v2813_v0  ;;  %2332 = vmatprep.subr.mxu0 %v1454_v45 }
  0xb9   : > { %1529 = vmatprep.subr.mxu1 %v2813_v0  ;;  %2333 = vmatpush3.msra.mxu0 %v1454_v45 }
  0xba   : > { %1530 = vmatpush2.msra.mxu1 %v1437_v46  ;;  %2334 = vmatprep.subr.mxu0 %v1453_v47 }
  0xbb   : > { %2093 = vmatmul.mubr.msk.f32.gmra.mxu0 %vm359_vm0, %v3100_v11  ;;  %1531 = vmatprep.subr.mxu1 %v2813_v0 }
  0xbc   : > { %640 = vmatprep.mubr.f32.mxu0 %v2813_v0  ;;  %2335 = vmatpush3.msra.mxu0 %v1453_v47 }
  0xbd   : > { %1532 = vmatpush2.msra.mxu1 %v1436_v48  ;;  %2336 = vmatprep.subr.mxu0 %v1452_v49 }
  0xbe   : > { %1533 = vmatprep.subr.mxu1 %v2813_v0  ;;  %2337 = vmatpush3.msra.mxu0 %v1452_v49 }
  0xbf   : > { %2094 = vmatmul.mubr.msk.f32.gmra.mxu0 %vm359_vm0, %v3103_v12  ;;  %1534 = vmatpush2.msra.mxu1 %v1435_v50 }
  0xc0   : > { %646 = vmatprep.mubr.f32.mxu0 %v2813_v0  ;;  %2338 = vmatprep.subr.mxu0 %v1451_v51 }
  0xc1   : > { %1535 = vmatprep.subr.mxu1 %v2813_v0  ;;  %2339 = vmatpush3.msra.mxu0 %v1451_v51 }
  0xc2   : > { %1536 = vmatpush2.msra.mxu1 %v1434_v52  ;;  %2340 = vmatprep.subr.mxu0 %v1450_v53 }
  0xc3   : > { %2095 = vmatmul.mubr.msk.f32.gmra.mxu0 %vm359_vm0, %v3114_v14 }
  0xc4   : > { %652 = vmatprep.mubr.f32.mxu0 %v2813_v0  ;;  %2341 = vmatpush3.msra.mxu0 %v1450_v53 }
  0xc7   : > { %2096 = vmatmul.mubr.msk.f32.gmra.mxu0 %vm359_vm0, %v3118_v15 }
  0xc8   : > { %658 = vmatprep.mubr.f32.mxu0 %v2813_v0 }
  0xcb   : > { %2097 = vmatmul.mubr.msk.f32.gmra.mxu0 %vm359_vm0, %v3129_v18 }
  0xcc   : > { %664 = vmatprep.mubr.f32.mxu0 %v2813_v0 }
  0xcf   : > { %2098 = vmatmul.mubr.msk.f32.gmra.mxu0 %vm359_vm0, %v3132_v19 }
  0xd0   : > { %670 = vmatprep.mubr.f32.mxu0 %v2813_v0 }
  0xd3   : > { %2099 = vmatmul.mubr.msk.f32.gmra.mxu0 %vm359_vm0, %v3143_v21 }
  0xd4   : > { %676 = vmatprep.mubr.f32.mxu0 %v2813_v0 }
  0xd7   : > { %2100 = vmatmul.mubr.msk.f32.gmra.mxu0 %vm359_vm0, %v3147_v22 }
  0xd8   : > { %682 = vmatprep.mubr.f32.mxu0 %v2813_v0 }
  0xdb   : > { %2101 = vmatmul.mubr.msk.f32.gmra.mxu0 %vm359_vm0, %v3158_v25 }
  0xdc   : > { %688 = vmatprep.mubr.f32.mxu0 %v2813_v0 }
  0xdf   : > { %2102 = vmatmul.mubr.msk.f32.gmra.mxu0 %vm359_vm0, %v3161_v26 }
  0xe0   : > { %694 = vmatprep.mubr.f32.mxu0 %v2813_v0 }
  0xe3   : > { %2103 = vmatmul.mubr.msk.f32.gmra.mxu0 %vm359_vm0, %v3172_v27 }
  0xe4   : > { %700 = vmatprep.mubr.f32.mxu0 %v2813_v0 }
  0xe7   : > { %2104 = vmatmul.mubr.msk.f32.gmra.mxu0 %vm359_vm0, %v3176_v28 }
  0xe8   : > { %706 = vmatprep.mubr.f32.mxu0 %v2813_v0 }
  0xeb   : > { %2105 = vmatmul.mubr.msk.f32.gmra.mxu0 %vm359_vm0, %v3186_v29 }
 0x12f   : > { %v522_v63 = vpop.f32.mrf.mxu0  ;;  %v2264_v1 = vpop.f32.mrf.mxu1 }
 0x130   : > { %v523_v0 = vadd.f32 %v522_v63, %v3255_v60  ;;  %v785_v2 = vadd.f32 %v2264_v1, %v3257_v61 }
 0x131   : > { %v524_v3 = vpop.f32.mrf.mxu0  ;;  %v779_v6 = vpop.f32.mrf.mxu1 }
 0x132   : > { %v1034_v4 = vmul.f32 0.70710677, %v523_v0  ;;  %v525_v5 = vadd.f32 %v524_v3, %v3259_v62  ;;  %v1039_v7 = vmul.f32 0.70710677, %v785_v2  ;;  %v780_v8 = vadd.f32 %v779_v6, %v3257_v61 }
 0x133   : > { %v528_v9 = vpop.f32.mrf.mxu0  ;;  %v938_v33 = vmul.f32 0.5, %v523_v0  ;;  %v943_v36 = vmul.f32 0.5, %v785_v2 }
 0x134   : > { %2464 = verf.f32 %v1034_v4  ;;  %v1035_v10 = vmul.f32 0.70710677, %v525_v5  ;;  %v529_v11 = vadd.f32 %v528_v9, %v3255_v60  ;;  %v2267_v12 = vpop.f32.mrf.mxu1  ;;  %v1036_v13 = vmul.f32 0.70710677, %v780_v8 }
 0x135   : > { %2466 = verf.f32 %v1039_v7  ;;  %v530_v14 = vpop.f32.mrf.mxu0  ;;  %v795_v19 = vadd.f32 %v2267_v12, %v3257_v61  ;;  %v939_v37 = vmul.f32 0.5, %v525_v5  ;;  %v940_v38 = vmul.f32 0.5, %v780_v8 }
 0x136   : > { %2468 = verf.f32 %v1035_v10  ;;  %v1037_v15 = vmul.f32 0.70710677, %v529_v11  ;;  %v531_v16 = vadd.f32 %v530_v14, %v3259_v62  ;;  %v789_v17 = vpop.f32.mrf.mxu1  ;;  %v3274_v42 = vmul.f32 0.5, %v529_v11 }
 0x137   : > { %2470 = verf.f32 %v1036_v13  ;;  %v534_v18 = vpop.f32.mrf.mxu0  ;;  %v790_v20 = vadd.f32 %v789_v17, %v3257_v61  ;;  %v1045_v30 = vmul.f32 0.70710677, %v795_v19  ;;  %v3279_v46 = vmul.f32 0.5, %v795_v19 }
 0x138   : > { %2472 = verf.f32 %v1037_v15  ;;  %v1038_v21 = vmul.f32 0.70710677, %v531_v16  ;;  %v535_v22 = vadd.f32 %v534_v18, %v3255_v60  ;;  %v2270_v23 = vpop.f32.mrf.mxu1  ;;  %v3277_v45 = vmul.f32 0.5, %v531_v16 }
 0x139   : > { %v536_v24 = vpop.f32.mrf.mxu0  ;;  %v1042_v25 = vmul.f32 0.70710677, %v790_v20  ;;  %v805_v26 = vadd.f32 %v2270_v23, %v3257_v61  ;;  %v3281_v49 = vmul.f32 0.5, %v790_v20 }
 0x13a   : > { %2474 = verf.f32 %v1038_v21  ;;  %v1040_v27 = vmul.f32 0.70710677, %v535_v22  ;;  %v537_v28 = vadd.f32 %v536_v24, %v3259_v62  ;;  %v799_v29 = vpop.f32.mrf.mxu1  ;;  %v3284_v53 = vmul.f32 0.5, %v535_v22 }
 0x13b   : > { %2476 = verf.f32 %v1042_v25  ;;  %v540_v31 = vpop.f32.mrf.mxu0  ;;  %v800_v32 = vadd.f32 %v799_v29, %v3257_v61  ;;  %v1051_v40 = vmul.f32 0.70710677, %v805_v26  ;;  %v3286_v54 = vmul.f32 0.5, %v805_v26 }
 0x13c   : > { %2478 = verf.f32 %v1040_v27  ;;  %v1041_v34 = vmul.f32 0.70710677, %v537_v28  ;;  %v541_v35 = vadd.f32 %v540_v31, %v3255_v60  ;;  %v2273_v41 = vpop.f32.mrf.mxu1  ;;  %v3289_v59 = vmul.f32 0.5, %v537_v28 }
 0x13d   : > { %v542_v39 = vpop.f32.mrf.mxu0  ;;  %v1048_v48 = vmul.f32 0.70710677, %v800_v32  ;;  %v815_v56 = vadd.f32 %v2273_v41, %v3257_v61  ;;  %v3291_v0 = vmul.f32 0.5, %v800_v32 }
 0x13e   : > { %2480 = verf.f32 %v1041_v34  ;;  %v1043_v43 = vmul.f32 0.70710677, %v541_v35  ;;  %v543_v44 = vadd.f32 %v542_v39, %v3259_v62  ;;  %v809_v57 = vpop.f32.mrf.mxu1  ;;  %v3296_v7 = vmul.f32 0.5, %v541_v35 }
 0x13f   : > { %2482 = verf.f32 %v1045_v30  ;;  %v546_v47 = vpop.f32.mrf.mxu0  ;;  %v810_v10 = vadd.f32 %v809_v57, %v3257_v61  ;;  %v3303_v14 = vmul.f32 0.5, %v815_v56  ;;  %v1057_v15 = vmul.f32 0.70710677, %v815_v56 }
 0x140   : > { %2484 = verf.f32 %v1043_v43  ;;  %v1044_v50 = vmul.f32 0.70710677, %v543_v44  ;;  %v547_v51 = vadd.f32 %v546_v47, %v3255_v60  ;;  %v2276_v25 = vpop.f32.mrf.mxu1  ;;  %v3307_v27 = vmul.f32 0.5, %v543_v44 }
 0x141   : > { %v2465_v52 = vpop.eup %2464  ;;  %2486 = verf.f32 %v1051_v40  ;;  %v548_v55 = vpop.f32.mrf.mxu0  ;;  %v1054_v29 = vmul.f32 0.70710677, %v810_v10 }
 0x142   : > { %v2467_v58 = vpop.eup %2466  ;;  %2488 = verf.f32 %v1044_v50  ;;  %v1046_v63 = vmul.f32 0.70710677, %v547_v51  ;;  %v1226_v2 = vadd.f32 1.0, %v2465_v52  ;;  %v3294_v4 = vadd.f32 %v548_v55, %v3259_v62  ;;  %v819_v47 = vpop.f32.mrf.mxu1 }
 0x143   : > { %v2469_v1 = vpop.eup %2468  ;;  %v1231_v3 = vadd.f32 1.0, %v2467_v58  ;;  %2490 = verf.f32 %v1048_v48  ;;  %v552_v5 = vpop.f32.mrf.mxu0  ;;  %v3314_v40 = vmul.f32 0.5, %v547_v51 }
 0x144   : > { %v2471_v6 = vpop.eup %2470  ;;  %v3299_v8 = vadd.f32 %v552_v5, %v3255_v60  ;;  %v1227_v9 = vadd.f32 1.0, %v2469_v1  ;;  %v1047_v12 = vmul.f32 0.70710677, %v3294_v4  ;;  %2492 = verf.f32 %v1046_v63 }
 0x145   : > { %v2473_v11 = vpop.eup %2472  ;;  %v554_v13 = vpop.f32.mrf.mxu0  ;;  %v1228_v16 = vadd.f32 1.0, %v2471_v6  ;;  %v1327_v17 = vmul.f32 %v1231_v3, %v943_v36  ;;  %v1322_v21 = vmul.f32 %v1226_v2, %v938_v33  ;;  %v951_v5 = vmul.f32 0.5, %v3294_v4 }
 0x146   : > { %v555_v18 = vadd.f32 %v554_v13, %v3259_v62  ;;  %v1323_v19 = vmul.f32 %v1227_v9, %v939_v37  ;;  %2494 = verf.f32 %v1047_v12  ;;  %v1049_v22 = vmul.f32 0.70710677, %v3299_v8 }
 0x147   : > { %v2475_v20 = vpop.eup %2474  ;;  %v558_v23 = vpop.f32.mrf.mxu0  ;;  %v1324_v24 = vmul.f32 %v1228_v16, %v940_v38  ;;  %v1229_v30 = vadd.f32 1.0, %v2473_v11  ;;  %2496 = verf.f32 %v1057_v15  ;;  %v3311_v37 = vmul.f32 0.5, %v810_v10 }
 0x148   : > { %v2477_v26 = vpop.eup %2476  ;;  %v1050_v28 = vmul.f32 0.70710677, %v555_v18  ;;  %1537 = vmatprep.mubr.f32.mxu1 %v1323_v19  ;;  %v559_v32 = vadd.f32 %v558_v23, %v3255_v60  ;;  %v1230_v33 = vadd.f32 1.0, %v2475_v20  ;;  %v825_v38 = vadd.f32 %v2276_v25, %v3257_v61 }
 0x149   : > { %v2479_v31 = vpop.eup %2478  ;;  %2342 = vmatprep.mubr.f32.mxu0 %v1324_v24  ;;  %v560_v34 = vpop.f32.mrf.mxu0  ;;  %1538 = vmatmul.mubr.f32.vlgmr.msra.gmra.mxu1 %v1322_v21  ;;  %v1234_v35 = vadd.f32 1.0, %v2477_v26  ;;  %v1325_v52 = vmul.f32 %v1229_v30, %v3274_v42  ;;  %v820_v42 = vadd.f32 %v819_v47, %v3257_v61  ;;  %v3328_v6 = vmul.f32 0.5, %v3299_v8 }
 0x14a   : > { %2498 = verf.f32 %v1050_v28  ;;  %v561_v36 = vadd.f32 %v560_v34, %v3259_v62  ;;  %2343 = vmatmul.mubr.f32.vlgmr.msra.gmra.mxu0 %v1327_v17  ;;  %v1326_v43 = vmul.f32 %v1230_v33, %v3277_v45  ;;  %v1232_v55 = vadd.f32 1.0, %v2479_v31  ;;  %v2279_v8 = vpop.f32.mrf.mxu1 }
 0x14b   : > { %v2481_v39 = vpop.eup %2480  ;;  %2500 = verf.f32 %v1049_v22  ;;  %v564_v41 = vpop.f32.mrf.mxu0  ;;  %v1330_v44 = vmul.f32 %v1234_v35, %v3281_v49  ;;  %v1052_v57 = vmul.f32 0.70710677, %v559_v32  ;;  %v3320_v63 = vmul.f32 0.5, %v825_v38 }
 0x14c   : > { %v2483_v48 = vpop.eup %2482  ;;  %v1053_v50 = vmul.f32 0.70710677, %v561_v36  ;;  %2502 = verf.f32 %v1054_v29  ;;  %v565_v58 = vadd.f32 %v564_v41, %v3255_v60  ;;  %1542 = vmatprep.mubr.f32.mxu1 %v1326_v43  ;;  %v1233_v1 = vadd.f32 1.0, %v2481_v39 }
 0x14d   : > { %v2485_v56 = vpop.eup %2484  ;;  %v566_v51 = vpop.f32.mrf.mxu0  ;;  %2345 = vmatprep.mubr.f32.mxu0 %v1330_v44  ;;  %1543 = vmatmul.mubr.f32.gmra.mxu1 %v1325_v52  ;;  %v1063_v2 = vmul.f32 0.70710677, %v825_v38  ;;  %v1237_v11 = vadd.f32 1.0, %v2483_v48  ;;  %v3331_v13 = vmul.f32 0.5, %v555_v18  ;;  %v1328_v16 = vmul.f32 %v1232_v55, %v3284_v53 }
 0x14e   : > { %v3322_v45 = vpop.eup %2486  ;;  %2504 = verf.f32 %v1053_v50  ;;  %v567_v49 = vadd.f32 %v566_v51, %v3259_v62  ;;  %v1329_v10 = vmul.f32 %v1233_v1, %v3289_v59  ;;  %v1235_v17 = vadd.f32 1.0, %v2485_v56  ;;  %v829_v38 = vpop.f32.mrf.mxu1 }
 0x14f   : > { %v2489_v3 = vpop.eup %2488  ;;  %v570_v9 = vpop.f32.mrf.mxu0  ;;  %2506 = verf.f32 %v1052_v57  ;;  %v1055_v19 = vmul.f32 0.70710677, %v565_v58  ;;  %v1333_v4 = vmul.f32 %v1237_v11, %v3279_v46  ;;  %v3335_v22 = vmul.f32 0.5, %v559_v32 }
 0x150   : > { %v2491_v12 = vpop.eup %2490  ;;  %v1056_v15 = vmul.f32 0.70710677, %v567_v49  ;;  %1547 = vmatprep.mubr.f32.mxu1 %v1329_v10  ;;  %v1236_v21 = vadd.f32 1.0, %v2489_v3  ;;  %2508 = verf.f32 %v1063_v2  ;;  %v1060_v23 = vmul.f32 0.70710677, %v820_v42  ;;  %v2282_v3 = vpop.f32.mrf.mxu1 }
 0x151   : > { %v572_v20 = vpop.f32.mrf.mxu0  ;;  %1548 = vmatmul.mubr.f32.gmra.mxu1 %v1328_v16  ;;  %v2493_v18 = vpop.eup %2492  ;;  %v571_v53 = vadd.f32 %v570_v9, %v3255_v60  ;;  %2346 = vmatmul.mubr.f32.gmra.mxu0 %v1333_v4  ;;  %v1240_v26 = vadd.f32 1.0, %v2491_v12  ;;  %v3340_v46 = vmul.f32 0.5, %v561_v36  ;;  %v1331_v30 = vmul.f32 %v1235_v17, %v3296_v7 }
 0x152   : > { %v573_v59 = vadd.f32 %v572_v20, %v3259_v62  ;;  %2510 = verf.f32 %v1056_v15  ;;  %v1332_v25 = vmul.f32 %v1236_v21, %v3307_v27  ;;  %v835_v31 = vadd.f32 %v2279_v8, %v3257_v61 }
 0x153   : > { %v576_v24 = vpop.f32.mrf.mxu0  ;;  %v2495_v28 = vpop.eup %2494  ;;  %2512 = verf.f32 %v1055_v19  ;;  %v3344_v32 = vmul.f32 0.5, %v820_v42  ;;  %v1336_v35 = vmul.f32 %v1240_v26, %v3291_v0  ;;  %v3349_v27 = vmul.f32 0.5, %v565_v58 }
 0x154   : > { %v1059_v29 = vmul.f32 0.70710677, %v573_v59  ;;  %1552 = vmatprep.mubr.f32.mxu1 %v1332_v25  ;;  %v1239_v33 = vadd.f32 1.0, %v2495_v28  ;;  %v3347_v39 = vpop.eup %2496  ;;  %2514 = verf.f32 %v1060_v23  ;;  %v577_v36 = vadd.f32 %v576_v24, %v3255_v60  ;;  %v839_v23 = vpop.f32.mrf.mxu1 }
 0x155   : > { %v578_v34 = vpop.f32.mrf.mxu0  ;;  %1553 = vmatmul.mubr.f32.gmra.mxu1 %v1331_v30  ;;  %v1058_v43 = vmul.f32 0.70710677, %v571_v53  ;;  %2348 = vmatprep.mubr.f32.mxu0 %v1336_v35  ;;  %v1238_v48 = vadd.f32 1.0, %v2493_v18  ;;  %v3353_v0 = vmul.f32 0.5, %v567_v49  ;;  %v3355_v52 = vmul.f32 0.5, %v571_v53 }
 0x156   : > { %v579_v7 = vadd.f32 %v578_v34, %v3259_v62  ;;  %2516 = verf.f32 %v1059_v29  ;;  %v1335_v47 = vmul.f32 %v1239_v33, %v951_v5  ;;  %v1069_v55 = vmul.f32 0.70710677, %v835_v31 }
 0x157   : > { %v2499_v41 = vpop.eup %2498  ;;  %v582_v44 = vpop.f32.mrf.mxu0  ;;  %v830_v56 = vadd.f32 %v829_v38, %v3257_v61  ;;  %v1334_v1 = vmul.f32 %v1238_v48, %v3314_v40  ;;  %v1243_v2 = vadd.f32 1.0, %v3322_v45  ;;  %v1061_v5 = vmul.f32 0.70710677, %v577_v36 }
 0x158   : > { %v2501_v50 = vpop.eup %2500  ;;  %v1062_v58 = vmul.f32 0.70710677, %v579_v7  ;;  %1557 = vmatprep.mubr.f32.mxu1 %v1335_v47  ;;  %v1242_v42 = vadd.f32 1.0, %v2499_v41  ;;  %v583_v9 = vadd.f32 %v582_v44, %v3255_v60  ;;  %v3361_v49 = vmul.f32 0.5, %v835_v31  ;;  %v2285_v44 = vpop.f32.mrf.mxu1 }
 0x159   : > { %v2503_v57 = vpop.eup %2502  ;;  %v584_v51 = vpop.f32.mrf.mxu0  ;;  %2518 = verf.f32 %v1058_v43  ;;  %1558 = vmatmul.mubr.f32.gmra.mxu1 %v1334_v1  ;;  %v1339_v12 = vmul.f32 %v1243_v2, %v3286_v54  ;;  %v1241_v40 = vadd.f32 1.0, %v2501_v50  ;;  %v3366_v17 = vmul.f32 0.5, %v573_v59 }
 0x15a   : > { %v585_v10 = vadd.f32 %v584_v51, %v3259_v62  ;;  %v1338_v16 = vmul.f32 %v1242_v42, %v3331_v13  ;;  %2520 = verf.f32 %v1069_v55  ;;  %v1066_v45 = vmul.f32 0.70710677, %v830_v56 }
 0x15b   : > { %v2505_v11 = vpop.eup %2504  ;;  %v588_v15 = vpop.f32.mrf.mxu0  ;;  %v845_v19 = vadd.f32 %v2282_v3, %v3257_v61  ;;  %2522 = verf.f32 %v1062_v58  ;;  %2349 = vmatmul.mubr.f32.gmra.mxu0 %v1339_v12  ;;  %v1337_v21 = vmul.f32 %v1241_v40, %v3328_v6  ;;  %v1064_v18 = vmul.f32 0.70710677, %v583_v9 }
 0x15c   : > { %v1065_v20 = vmul.f32 0.70710677, %v585_v10  ;;  %1562 = vmatprep.mubr.f32.mxu1 %v1338_v16  ;;  %v1245_v8 = vadd.f32 1.0, %v2505_v11  ;;  %v2507_v54 = vpop.eup %2506  ;;  %2524 = verf.f32 %v1061_v5  ;;  %v589_v13 = vadd.f32 %v588_v15, %v3255_v60  ;;  %v849_v11 = vpop.f32.mrf.mxu1 }
 0x15d   : > { %v590_v4 = vpop.f32.mrf.mxu0  ;;  %v3374_v53 = vpop.eup %2508  ;;  %v3376_v24 = vmul.f32 0.5, %v577_v36  ;;  %v3378_v25 = vmul.f32 0.5, %v830_v56  ;;  %1563 = vmatmul.mubr.f32.gmra.mxu1 %v1337_v21  ;;  %v1246_v28 = vadd.f32 1.0, %v2503_v57  ;;  %v3381_v30 = vmul.f32 0.5, %v579_v7 }
 0x15e   : > { %v3372_v59 = vadd.f32 %v590_v4, %v3259_v62  ;;  %v1341_v6 = vmul.f32 %v1245_v8, %v3340_v46  ;;  %2526 = verf.f32 %v1066_v45  ;;  %v1075_v31 = vmul.f32 0.70710677, %v845_v19 }
 0x15f   : > { %v594_v26 = vpop.f32.mrf.mxu0  ;;  %v2511_v29 = vpop.eup %2510  ;;  %v3384_v34 = vadd.f32 %v839_v23, %v3257_v61  ;;  %v3386_v33 = vmul.f32 0.5, %v583_v9  ;;  %2528 = verf.f32 %v1065_v20  ;;  %v1342_v35 = vmul.f32 %v1246_v28, %v3311_v37 }
 0x160   : > { %1567 = vmatprep.mubr.f32.mxu1 %v1341_v6  ;;  %v1244_v36 = vadd.f32 1.0, %v2507_v54  ;;  %v2513_v41 = vpop.eup %2512  ;;  %2530 = verf.f32 %v1064_v18  ;;  %v1067_v46 = vmul.f32 0.70710677, %v589_v13  ;;  %v1068_v43 = vmul.f32 0.70710677, %v3372_v59  ;;  %v2288_v20 = vpop.f32.mrf.mxu1 }
 0x161   : > { %v596_v38 = vpop.f32.mrf.mxu0  ;;  %v2515_v47 = vpop.eup %2514  ;;  %v3394_v48 = vadd.f32 %v594_v26, %v3255_v60  ;;  %2351 = vmatprep.mubr.f32.mxu0 %v1342_v35  ;;  %v1249_v37 = vadd.f32 1.0, %v3347_v39  ;;  %v1248_v56 = vadd.f32 1.0, %v2511_v29  ;;  %v3398_v58 = vmul.f32 0.5, %v585_v10 }
 0x162   : > { %v3391_v7 = vadd.f32 %v596_v38, %v3259_v62  ;;  %v1340_v50 = vmul.f32 %v1244_v36, %v3335_v22  ;;  %2532 = verf.f32 %v1075_v31  ;;  %v1072_v51 = vmul.f32 0.70710677, %v3384_v34 }
 0x163   : > { %v600_v55 = vpop.f32.mrf.mxu0  ;;  %v2517_v57 = vpop.eup %2516  ;;  %v1345_v2 = vmul.f32 %v1249_v37, %v3303_v14  ;;  %v1344_v42 = vmul.f32 %v1248_v56, %v3353_v0  ;;  %v1247_v22 = vadd.f32 1.0, %v2513_v41  ;;  %v3407_v39 = vadd.f32 %v2285_v44, %v3257_v61 }
 0x164   : > { %v3402_v1 = vadd.f32 %v600_v55, %v3255_v60  ;;  %1568 = vmatmul.mubr.f32.gmra.mxu1 %v1340_v50  ;;  %2534 = verf.f32 %v1068_v43  ;;  %v3409_v5 = vmul.f32 0.5, %v845_v19  ;;  %v1071_v9 = vmul.f32 0.70710677, %v3391_v7  ;;  %v859_v41 = vpop.f32.mrf.mxu1 }
 0x165   : > { %v602_v3 = vpop.f32.mrf.mxu0  ;;  %2536 = verf.f32 %v1067_v46  ;;  %v1070_v12 = vmul.f32 0.70710677, %v3394_v48  ;;  %2352 = vmatmul.mubr.f32.gmra.mxu0 %v1345_v2  ;;  %1572 = vmatprep.mubr.f32.mxu1 %v1344_v42  ;;  %v1343_v14 = vmul.f32 %v1247_v22, %v3349_v27  ;;  %v1251_v15 = vadd.f32 1.0, %v2517_v57 }
 0x166   : > { %v3413_v10 = vadd.f32 %v602_v3, %v3259_v62  ;;  %v2519_v16 = vpop.eup %2518  ;;  %v3417_v40 = vmul.f32 0.5, %v589_v13  ;;  %2538 = verf.f32 %v1072_v51  ;;  %v1073_v45 = vmul.f32 0.70710677, %v3402_v1  ;;  %v3450_v56 = vpop.f32.mrf.mxu1 }
 0x167   : > { %v606_v0 = vpop.f32.mrf.mxu0  ;;  %v3423_v4 = vpop.eup %2520  ;;  %v1081_v21 = vmul.f32 0.70710677, %v3407_v39  ;;  %v1347_v8 = vmul.f32 %v1251_v15, %v3366_v17  ;;  %v1252_v27 = vadd.f32 1.0, %v2515_v47  ;;  %v3428_v54 = vadd.f32 %v849_v11, %v3257_v61 }
 0x168   : > { %v3421_v19 = vadd.f32 %v606_v0, %v3255_v60  ;;  %1573 = vmatmul.mubr.f32.gmra.mxu1 %v1343_v14  ;;  %v2523_v18 = vpop.eup %2522  ;;  %v3431_v13 = vmul.f32 0.5, %v3372_v59  ;;  %2540 = verf.f32 %v1071_v9  ;;  %v1074_v26 = vmul.f32 0.70710677, %v3413_v10  ;;  %v3475_v0 = vpop.f32.mrf.mxu1 }
 0x169   : > { %v608_v23 = vpop.f32.mrf.mxu0  ;;  %v2525_v28 = vpop.eup %2524  ;;  %2542 = verf.f32 %v1070_v12  ;;  %1577 = vmatprep.mubr.f32.mxu1 %v1347_v8  ;;  %v1348_v17 = vmul.f32 %v1252_v27, %v3344_v32  ;;  %v1250_v31 = vadd.f32 1.0, %v2519_v16  ;;  %v3440_v38 = vmul.f32 0.5, %v3384_v34 }
 0x16a   : > { %v3435_v6 = vadd.f32 %v608_v23, %v3259_v62  ;;  %v1076_v29 = vmul.f32 0.70710677, %v3421_v19  ;;  %2544 = verf.f32 %v1073_v45  ;;  %v1078_v59 = vmul.f32 0.70710677, %v3428_v54 }
 0x16b   : > { %v612_v35 = vpop.f32.mrf.mxu0  ;;  %v1255_v36 = vadd.f32 1.0, %v3374_v53  ;;  %v2527_v46 = vpop.eup %2526  ;;  %2546 = verf.f32 %v1081_v21  ;;  %2354 = vmatprep.mubr.f32.mxu0 %v1348_v17  ;;  %v1346_v43 = vmul.f32 %v1250_v31, %v3355_v52  ;;  %v1254_v32 = vadd.f32 1.0, %v2523_v18 }
 0x16c   : > { %v3446_v44 = vadd.f32 %v612_v35, %v3255_v60  ;;  %v2529_v50 = vpop.eup %2528  ;;  %2548 = verf.f32 %v1074_v26  ;;  %v1077_v34 = vmul.f32 0.70710677, %v3435_v6  ;;  %v1253_v55 = vadd.f32 1.0, %v2525_v28  ;;  %v3486_v18 = vpop.f32.mrf.mxu1 }
 0x16d   : > { %v614_v47 = vpop.f32.mrf.mxu0  ;;  %v1351_v37 = vmul.f32 %v1255_v36, %v3320_v63  ;;  %v2531_v53 = vpop.eup %2530  ;;  %v3453_v57 = vmul.f32 0.5, %v3394_v48  ;;  %2550 = verf.f32 %v1076_v29  ;;  %1578 = vmatmul.mubr.f32.gmra.mxu1 %v1346_v43  ;;  %v1350_v52 = vmul.f32 %v1254_v32, %v3381_v30 }
 0x16e   : > { %v615_v51 = vadd.f32 %v614_v47, %v3259_v62  ;;  %v3458_v42 = vmul.f32 0.5, %v3391_v7  ;;  %v3461_v3 = vmul.f32 0.5, %v3402_v1  ;;  %2552 = verf.f32 %v1078_v59  ;;  %v3504_v32 = vpop.f32.mrf.mxu1 }
 0x16f   : > { %v618_v2 = vpop.f32.mrf.mxu0  ;;  %2355 = vmatmul.mubr.f32.gmra.mxu0 %v1351_v37  ;;  %v865_v63 = vadd.f32 %v2288_v20, %v3257_v61  ;;  %v3464_v22 = vpop.eup %2532  ;;  %v1079_v48 = vmul.f32 0.70710677, %v3446_v44  ;;  %1582 = vmatprep.mubr.f32.mxu1 %v1350_v52  ;;  %v1349_v30 = vmul.f32 %v1253_v55, %v3376_v24  ;;  %v1257_v11 = vadd.f32 1.0, %v2529_v50 }
 0x170   : > { %v619_v9 = vadd.f32 %v618_v2, %v3255_v60  ;;  %v3470_v7 = vmul.f32 0.5, %v3413_v10  ;;  %v3473_v1 = vmul.f32 0.5, %v3407_v39  ;;  %2554 = verf.f32 %v1077_v34  ;;  %v3518_v2 = vpop.f32.mrf.mxu1 }
 0x171   : > { %v620_v12 = vpop.f32.mrf.mxu0  ;;  %v1258_v14 = vadd.f32 1.0, %v2527_v46  ;;  %v2535_v15 = vpop.eup %2534  ;;  %v1080_v16 = vmul.f32 0.70710677, %v615_v51  ;;  %1583 = vmatmul.mubr.f32.gmra.mxu1 %v1349_v30  ;;  %v1353_v45 = vmul.f32 %v1257_v11, %v3398_v58  ;;  %v3482_v20 = vadd.f32 %v859_v41, %v3257_v61 }
 0x172   : > { %v3479_v24 = vadd.f32 %v620_v12, %v3259_v62  ;;  %v2537_v21 = vpop.eup %2536  ;;  %v1087_v8 = vmul.f32 0.70710677, %v865_v63  ;;  %v1256_v27 = vadd.f32 1.0, %v2531_v53  ;;  %v1261_v23 = vadd.f32 1.0, %v3423_v4 }
 0x173   : > { %v624_v10 = vpop.f32.mrf.mxu0  ;;  %v1354_v39 = vmul.f32 %v1258_v14, %v3378_v25  ;;  %v2539_v26 = vpop.eup %2538  ;;  %v3489_v28 = vmul.f32 0.5, %v3421_v19  ;;  %v3492_v58 = vmul.f32 0.5, %v3428_v54  ;;  %2556 = verf.f32 %v1079_v48  ;;  %1587 = vmatprep.mubr.f32.mxu1 %v1353_v45 }
 0x174   : > { %v1082_v29 = vmul.f32 0.70710677, %v619_v9  ;;  %v1083_v31 = vmul.f32 0.70710677, %v3479_v24  ;;  %v1352_v25 = vmul.f32 %v1256_v27, %v3386_v33  ;;  %v1357_v4 = vmul.f32 %v1261_v23, %v3361_v49  ;;  %v3539_v23 = vpop.f32.mrf.mxu1 }
 0x175   : > { %v626_v17 = vpop.f32.mrf.mxu0  ;;  %2357 = vmatprep.mubr.f32.mxu0 %v1354_v39  ;;  %v1260_v35 = vadd.f32 1.0, %v2535_v15  ;;  %v2541_v59 = vpop.eup %2540  ;;  %v3498_v36 = vmul.f32 0.5, %v3435_v6  ;;  %2558 = verf.f32 %v1080_v16  ;;  %v1084_v19 = vmul.f32 0.70710677, %v3482_v20 }
 0x176   : > { %v1259_v54 = vadd.f32 1.0, %v2537_v21  ;;  %v2543_v46 = vpop.eup %2542  ;;  %2560 = verf.f32 %v1087_v8  ;;  %1588 = vmatmul.mubr.f32.gmra.mxu1 %v1352_v25  ;;  %2358 = vmatmul.mubr.f32.gmra.mxu0 %v1357_v4  ;;  %v625_v43 = vadd.f32 %v624_v10, %v3255_v60  ;;  %v627_v49 = vadd.f32 %v626_v17, %v3259_v62 }
 0x177   : > { %v630_v41 = vpop.f32.mrf.mxu0  ;;  %v1356_v33 = vmul.f32 %v1260_v35, %v3431_v13  ;;  %v2545_v47 = vpop.eup %2544  ;;  %v3507_v6 = vmul.f32 0.5, %v3446_v44  ;;  %v3509_v50 = vmul.f32 0.5, %v615_v51  ;;  %2562 = verf.f32 %v1082_v29 }
 0x178   : > { %v3511_v34 = vmul.f32 0.5, %v865_v63  ;;  %v3513_v55 = vpop.eup %2546  ;;  %2564 = verf.f32 %v1083_v31  ;;  %v1355_v13 = vmul.f32 %v1259_v54, %v3417_v40  ;;  %v875_v53 = vadd.f32 %v3450_v56, %v3257_v61 }
 0x179   : > { %v632_v37 = vpop.f32.mrf.mxu0  ;;  %1592 = vmatprep.mubr.f32.mxu1 %v1356_v33  ;;  %v1263_v52 = vadd.f32 1.0, %v2541_v59  ;;  %v2549_v44 = vpop.eup %2548  ;;  %v3520_v48 = vmul.f32 0.5, %v619_v9  ;;  %2566 = verf.f32 %v1084_v19  ;;  %v631_v51 = vadd.f32 %v630_v41, %v3255_v60 }
 0x17a   : > { %v1264_v63 = vadd.f32 1.0, %v2539_v26  ;;  %v3523_v11 = vpop.eup %2550  ;;  %v1085_v12 = vmul.f32 0.70710677, %v625_v43  ;;  %v1086_v14 = vmul.f32 0.70710677, %v627_v49  ;;  %1593 = vmatmul.mubr.f32.gmra.mxu1 %v1355_v13  ;;  %v633_v56 = vadd.f32 %v632_v37, %v3259_v62  ;;  %v3552_v41 = vpop.f32.mrf.mxu1 }
 0x17b   : > { %v636_v30 = vpop.f32.mrf.mxu0  ;;  %v1359_v40 = vmul.f32 %v1263_v52, %v3458_v42  ;;  %v2553_v15 = vpop.eup %2552  ;;  %v870_v9 = vadd.f32 %v3475_v0, %v3257_v61  ;;  %v1262_v45 = vadd.f32 1.0, %v2543_v46  ;;  %v1267_v10 = vadd.f32 1.0, %v3464_v22 }
 0x17c   : > { %v1360_v16 = vmul.f32 %v1264_v63, %v3440_v38  ;;  %v3532_v8 = vmul.f32 0.5, %v3479_v24  ;;  %v3535_v39 = vmul.f32 0.5, %v3482_v20  ;;  %v3537_v27 = vmul.f32 0.5, %v625_v43 }
 0x17d   : > { %v638_v21 = vpop.f32.mrf.mxu0  ;;  %v1093_v42 = vmul.f32 0.70710677, %v875_v53  ;;  %1597 = vmatprep.mubr.f32.mxu1 %v1359_v40  ;;  %v2555_v38 = vpop.eup %2554  ;;  %v1088_v26 = vmul.f32 0.70710677, %v631_v51  ;;  %v1358_v0 = vmul.f32 %v1262_v45, %v3453_v57  ;;  %v1363_v22 = vmul.f32 %v1267_v10, %v3409_v5 }
 0x17e   : > { %2360 = vmatprep.mubr.f32.mxu0 %v1360_v16  ;;  %v1266_v29 = vadd.f32 1.0, %v2549_v44  ;;  %2568 = verf.f32 %v1085_v12  ;;  %v1089_v24 = vmul.f32 0.70710677, %v633_v56  ;;  %v637_v20 = vadd.f32 %v636_v30, %v3255_v60 }
 0x17f   : > { %v642_v17 = vpop.f32.mrf.mxu0  ;;  %v1265_v31 = vadd.f32 1.0, %v2545_v47  ;;  %v3544_v25 = vmul.f32 0.5, %v627_v49  ;;  %2570 = verf.f32 %v1086_v14  ;;  %v1090_v4 = vmul.f32 0.70710677, %v870_v9  ;;  %1598 = vmatmul.mubr.f32.gmra.mxu1 %v1358_v0  ;;  %2361 = vmatmul.mubr.f32.gmra.mxu0 %v1363_v22 }
 0x180   : > { %v1362_v35 = vmul.f32 %v1266_v29, %v3470_v7  ;;  %v2557_v19 = vpop.eup %2556  ;;  %v3547_v57 = vmul.f32 0.5, %v631_v51  ;;  %v3549_v5 = vmul.f32 0.5, %v875_v53  ;;  %2572 = verf.f32 %v1093_v42 }
 0x181   : > { %v644_v59 = vpop.f32.mrf.mxu0  ;;  %v639_v54 = vadd.f32 %v638_v21, %v3259_v62  ;;  %2574 = verf.f32 %v1088_v26  ;;  %v1361_v46 = vmul.f32 %v1265_v31, %v3461_v3  ;;  %v643_v43 = vadd.f32 %v642_v17, %v3255_v60 }
 0x182   : > { %1602 = vmatprep.mubr.f32.mxu1 %v1362_v35  ;;  %v1269_v33 = vadd.f32 1.0, %v2555_v38  ;;  %v2559_v7 = vpop.eup %2558  ;;  %v3556_v47 = vmul.f32 0.5, %v633_v56  ;;  %2576 = verf.f32 %v1089_v24  ;;  %v1091_v37 = vmul.f32 0.70710677, %v637_v20  ;;  %v3569_v56 = vpop.f32.mrf.mxu1 }
 0x183   : > { %v648_v49 = vpop.f32.mrf.mxu0  ;;  %v1270_v13 = vadd.f32 1.0, %v2553_v15  ;;  %v3558_v53 = vpop.eup %2560  ;;  %v3560_v52 = vmul.f32 0.5, %v870_v9  ;;  %2578 = verf.f32 %v1090_v4  ;;  %1603 = vmatmul.mubr.f32.gmra.mxu1 %v1361_v46  ;;  %v885_v44 = vadd.f32 %v3486_v18, %v3257_v61 }
 0x184   : > { %v1365_v3 = vmul.f32 %v1269_v33, %v3498_v36  ;;  %v2563_v63 = vpop.eup %2562  ;;  %v3565_v30 = vmul.f32 0.5, %v637_v20  ;;  %v1092_v12 = vmul.f32 0.70710677, %v639_v54  ;;  %v645_v40 = vadd.f32 %v644_v59, %v3259_v62  ;;  %v3583_v24 = vpop.f32.mrf.mxu1 }
 0x185   : > { %v650_v51 = vpop.f32.mrf.mxu0  ;;  %v1366_v14 = vmul.f32 %v1270_v13, %v3492_v58  ;;  %v2565_v15 = vpop.eup %2564  ;;  %v3571_v16 = vmul.f32 0.5, %v639_v54  ;;  %v1094_v9 = vmul.f32 0.70710677, %v643_v43  ;;  %v1268_v18 = vadd.f32 1.0, %v3523_v11 }
 0x186   : > { %1607 = vmatprep.mubr.f32.mxu1 %v1365_v3  ;;  %v1273_v36 = vadd.f32 1.0, %v3513_v55  ;;  %v2567_v10 = vpop.eup %2566  ;;  %2580 = verf.f32 %v1091_v37  ;;  %v3575_v21 = vmul.f32 0.5, %v643_v43  ;;  %v880_v58 = vadd.f32 %v3504_v32, %v3257_v61  ;;  %v909_v37 = vpop.f32.mrf.mxu1 }
 0x187   : > { %v654_v45 = vpop.f32.mrf.mxu0  ;;  %2363 = vmatprep.mubr.f32.mxu0 %v1366_v14  ;;  %v1272_v42 = vadd.f32 1.0, %v2559_v7  ;;  %v1099_v38 = vmul.f32 0.70710677, %v885_v44  ;;  %v1364_v26 = vmul.f32 %v1268_v18, %v3489_v28  ;;  %v1271_v22 = vadd.f32 1.0, %v2557_v19 }
 0x188   : > { %v1369_v0 = vmul.f32 %v1273_v36, %v3473_v1  ;;  %2582 = verf.f32 %v1092_v12  ;;  %v1095_v11 = vmul.f32 0.70710677, %v645_v40  ;;  %v649_v55 = vadd.f32 %v648_v49, %v3255_v60 }
 0x189   : > { %v656_v29 = vpop.f32.mrf.mxu0  ;;  %v1368_v17 = vmul.f32 %v1272_v42, %v3509_v50  ;;  %2584 = verf.f32 %v1094_v9  ;;  %v3585_v20 = vmul.f32 0.5, %v885_v44  ;;  %v3587_v32 = vmul.f32 0.5, %v645_v40  ;;  %1608 = vmatmul.mubr.f32.gmra.mxu1 %v1364_v26 }
 0x18a   : > { %2364 = vmatmul.mubr.f32.gmra.mxu0 %v1369_v0  ;;  %v651_v28 = vadd.f32 %v650_v51, %v3259_v62  ;;  %v1096_v31 = vmul.f32 0.70710677, %v880_v58  ;;  %v895_v4 = vadd.f32 %v3518_v2, %v3257_v61  ;;  %v1275_v35 = vadd.f32 1.0, %v2565_v15 }
 0x18b   : > { %v660_v1 = vpop.f32.mrf.mxu0  ;;  %1612 = vmatprep.mubr.f32.mxu1 %v1368_v17  ;;  %v1276_v59 = vadd.f32 1.0, %v2567_v10  ;;  %v2569_v50 = vpop.eup %2568  ;;  %2586 = verf.f32 %v1099_v38  ;;  %v3592_v19 = vmul.f32 0.5, %v880_v58  ;;  %v1367_v54 = vmul.f32 %v1271_v22, %v3507_v6 }
 0x18c   : > { %v655_v46 = vadd.f32 %v654_v45, %v3255_v60  ;;  %v2571_v33 = vpop.eup %2570  ;;  %2588 = verf.f32 %v1095_v11  ;;  %v1097_v49 = vmul.f32 0.70710677, %v649_v55  ;;  %v3598_v7 = vadd.f32 %v3539_v23, %v3257_v61  ;;  %v2306_v58 = vpop.f32.mrf.mxu1 }
 0x18d   : > { %v662_v43 = vpop.f32.mrf.mxu0  ;;  %v1371_v2 = vmul.f32 %v1275_v35, %v3532_v8  ;;  %v3601_v13 = vpop.eup %2572  ;;  %v1098_v44 = vmul.f32 0.70710677, %v651_v28  ;;  %1613 = vmatmul.mubr.f32.gmra.mxu1 %v1367_v54  ;;  %v1372_v3 = vmul.f32 %v1276_v59, %v3535_v39  ;;  %v657_v6 = vadd.f32 %v656_v29, %v3259_v62 }
 0x18e   : > { %v1274_v51 = vadd.f32 1.0, %v2563_v63  ;;  %v3605_v14 = vpop.eup %2574  ;;  %2590 = verf.f32 %v1096_v31  ;;  %v1105_v40 = vmul.f32 0.70710677, %v895_v4  ;;  %v1279_v23 = vadd.f32 1.0, %v3558_v53  ;;  %v919_v35 = vpop.f32.mrf.mxu1 }
 0x18f   : > { %v666_v12 = vpop.f32.mrf.mxu0  ;;  %1617 = vmatprep.mubr.f32.mxu1 %v1371_v2  ;;  %v3610_v8 = vadd.f32 %v3552_v41, %v3257_v61  ;;  %v2577_v15 = vpop.eup %2576  ;;  %v3612_v9 = vmul.f32 0.5, %v649_v55  ;;  %v1100_v18 = vmul.f32 0.70710677, %v655_v46  ;;  %2366 = vmatprep.mubr.f32.mxu0 %v1372_v3  ;;  %v3616_v63 = vadd.f32 %v660_v1, %v3255_v60 }
 0x190   : > { %v1370_v39 = vmul.f32 %v1274_v51, %v3520_v48  ;;  %v2579_v45 = vpop.eup %2578  ;;  %2592 = verf.f32 %v1097_v49  ;;  %v3618_v10 = vmul.f32 0.5, %v651_v28  ;;  %v1102_v53 = vmul.f32 0.70710677, %v3598_v7 }
 0x191   : > { %v668_v36 = vpop.f32.mrf.mxu0  ;;  %v1375_v41 = vmul.f32 %v1279_v23, %v3511_v34  ;;  %2594 = verf.f32 %v1098_v44  ;;  %v1101_v42 = vmul.f32 0.70710677, %v657_v6  ;;  %v3624_v38 = vadd.f32 %v3569_v56, %v3257_v61 }
 0x192   : > { %1618 = vmatmul.mubr.f32.gmra.mxu1 %v1370_v39  ;;  %v1278_v48 = vadd.f32 1.0, %v2571_v33  ;;  %2596 = verf.f32 %v1105_v40  ;;  %v1111_v0 = vmul.f32 0.70710677, %v3610_v8  ;;  %v3628_v22 = vadd.f32 %v662_v43, %v3259_v62  ;;  %v2309_v40 = vpop.f32.mrf.mxu1 }
 0x193   : > { %v672_v26 = vpop.f32.mrf.mxu0  ;;  %2367 = vmatmul.mubr.f32.gmra.mxu0 %v1375_v41  ;;  %v1277_v29 = vadd.f32 1.0, %v2569_v50  ;;  %v3630_v11 = vpop.eup %2580  ;;  %v3632_v34 = vmul.f32 0.5, %v895_v4  ;;  %2598 = verf.f32 %v1100_v18  ;;  %v1103_v55 = vmul.f32 0.70710677, %v3616_v63 }
 0x194   : > { %v1374_v56 = vmul.f32 %v1278_v48, %v3544_v25  ;;  %2600 = verf.f32 %v1102_v53  ;;  %v1108_v28 = vmul.f32 0.70710677, %v3624_v38  ;;  %v3640_v31 = vadd.f32 %v3583_v24, %v3257_v61 }
 0x195   : > { %v674_v17 = vpop.f32.mrf.mxu0  ;;  %v1373_v1 = vmul.f32 %v1277_v29, %v3537_v27  ;;  %v2583_v59 = vpop.eup %2582  ;;  %v3642_v50 = vmul.f32 0.5, %v655_v46  ;;  %2602 = verf.f32 %v1101_v42  ;;  %v1104_v4 = vmul.f32 0.70710677, %v3628_v22 }
 0x196   : > { %1622 = vmatprep.mubr.f32.mxu1 %v1374_v56  ;;  %v3646_v25 = vadd.f32 %v666_v12, %v3255_v60  ;;  %v3650_v43 = vpop.eup %2584  ;;  %2604 = verf.f32 %v1111_v0  ;;  %v3653_v27 = vadd.f32 %v909_v37, %v3257_v61  ;;  %v1281_v24 = vadd.f32 1.0, %v2577_v15  ;;  %v929_v0 = vpop.f32.mrf.mxu1 }
 0x197   : > { %v3648_v54 = vpop.f32.mrf.mxu0  ;;  %1623 = vmatmul.mubr.f32.gmra.mxu1 %v1373_v1  ;;  %v1282_v33 = vadd.f32 1.0, %v2579_v45  ;;  %v3656_v46 = vmul.f32 0.5, %v3598_v7  ;;  %v3658_v49 = vmul.f32 0.5, %v657_v6  ;;  %2606 = verf.f32 %v1103_v55 }
 0x198   : > { %v3661_v2 = vadd.f32 %v668_v36, %v3259_v62  ;;  %v3665_v3 = vpop.eup %2586  ;;  %2608 = verf.f32 %v1108_v28  ;;  %v1117_v51 = vmul.f32 0.70710677, %v3640_v31  ;;  %v1377_v37 = vmul.f32 %v1281_v24, %v3556_v47 }
 0x199   : > { %v3663_v44 = vpop.f32.mrf.mxu0  ;;  %v1378_v12 = vmul.f32 %v1282_v33, %v3560_v52  ;;  %v2589_v7 = vpop.eup %2588  ;;  %2610 = verf.f32 %v1104_v4  ;;  %v1106_v6 = vmul.f32 0.70710677, %v3646_v25  ;;  %v1280_v23 = vadd.f32 1.0, %v3605_v14 }
 0x19a   : > { %v1285_v15 = vadd.f32 1.0, %v3601_v13  ;;  %v1114_v39 = vmul.f32 0.70710677, %v3653_v27  ;;  %1627 = vmatprep.mubr.f32.mxu1 %v1377_v37  ;;  %v3677_v36 = vadd.f32 %v2306_v58, %v3257_v61  ;;  %v3680_v47 = vadd.f32 %v672_v26, %v3255_v60 }
 0x19b   : > { %v3673_v18 = vpop.f32.mrf.mxu0  ;;  %2369 = vmatprep.mubr.f32.mxu0 %v1378_v12  ;;  %v3683_v52 = vadd.f32 %v919_v35, %v3257_v61  ;;  %v2591_v45 = vpop.eup %2590  ;;  %v1107_v14 = vmul.f32 0.70710677, %v3661_v2  ;;  %v1376_v13 = vmul.f32 %v1280_v23, %v3547_v57  ;;  %v1284_v41 = vadd.f32 1.0, %v2583_v59 }
 0x19c   : > { %v1381_v53 = vmul.f32 %v1285_v15, %v3549_v5  ;;  %v3691_v48 = vmul.f32 0.5, %v3610_v8  ;;  %v3694_v58 = vmul.f32 0.5, %v3616_v63  ;;  %2612 = verf.f32 %v1117_v51 }
 0x19d   : > { %v3688_v42 = vpop.f32.mrf.mxu0  ;;  %v1123_v26 = vmul.f32 0.70710677, %v3677_v36  ;;  %v3697_v29 = vpop.eup %2592  ;;  %2614 = verf.f32 %v1106_v6  ;;  %1628 = vmatmul.mubr.f32.gmra.mxu1 %v1376_v13  ;;  %v1109_v57 = vmul.f32 0.70710677, %v3680_v47  ;;  %v1380_v5 = vmul.f32 %v1284_v41, %v3571_v16 }
 0x19e   : > { %2370 = vmatmul.mubr.f32.gmra.mxu0 %v1381_v53  ;;  %v3702_v55 = vadd.f32 %v674_v17, %v3259_v62  ;;  %v2595_v63 = vpop.eup %2594  ;;  %v3707_v56 = vmul.f32 0.5, %v3624_v38  ;;  %2616 = verf.f32 %v1114_v39  ;;  %v1120_v28 = vmul.f32 0.70710677, %v3683_v52 }
 0x19f   : > { %v3704_v8 = vpop.f32.mrf.mxu0  ;;  %v1283_v1 = vadd.f32 1.0, %v3630_v11  ;;  %v3711_v35 = vpop.eup %2596  ;;  %v3714_v59 = vmul.f32 0.5, %v3628_v22  ;;  %2618 = verf.f32 %v1107_v14  ;;  %1632 = vmatprep.mubr.f32.mxu1 %v1380_v5  ;;  %v3717_v16 = vadd.f32 %v2309_v40, %v3257_v61 }
 0x1a0   : > { %v3720_v17 = vadd.f32 %v929_v0, %v3257_v61  ;;  %v3722_v4 = vpop.eup %2598  ;;  %v3725_v24 = vmul.f32 0.5, %v3640_v31  ;;  %2620 = verf.f32 %v1123_v26  ;;  %v1110_v11 = vmul.f32 0.70710677, %v3702_v55 }
 0x1a1   : > { %v692_v38 = vpop.f32.mrf.mxu0  ;;  %v1379_v22 = vmul.f32 %v1283_v1, %v3565_v30  ;;  %v2601_v33 = vpop.eup %2600  ;;  %v3730_v51 = vmul.f32 0.5, %v3646_v25  ;;  %v3733_v37 = vmul.f32 0.5, %v3653_v27  ;;  %2622 = verf.f32 %v1109_v57 }
 0x1a2   : > { %v3737_v61 = vadd.f32 %v3648_v54, %v3255_v60  ;;  %v2603_v31 = vpop.eup %2602  ;;  %2624 = verf.f32 %v1120_v28  ;;  %v1126_v40 = vmul.f32 0.70710677, %v3720_v17  ;;  %v1287_v30 = vadd.f32 1.0, %v2589_v7 }
 0x1a3   : > { %v3739_v12 = vpop.f32.mrf.mxu0  ;;  %1633 = vmatmul.mubr.f32.gmra.mxu1 %v1379_v22  ;;  %v1288_v6 = vadd.f32 1.0, %v2591_v45  ;;  %v3742_v23 = vpop.eup %2604  ;;  %v1129_v25 = vmul.f32 0.70710677, %v3717_v16  ;;  %v3747_v27 = vadd.f32 %v3663_v44, %v3259_v62  ;;  %v1286_v54 = vadd.f32 1.0, %v3650_v43 }
 0x1a4   : > { %v1291_v15 = vadd.f32 1.0, %v3665_v3  ;;  %v3753_v14 = vpop.eup %2606  ;;  %2626 = verf.f32 %v1110_v11  ;;  %v1383_v7 = vmul.f32 %v1287_v30, %v3587_v32  ;;  %v3759_v13 = vadd.f32 %v3673_v18, %v3255_v60 }
 0x1a5   : > { %v3751_v39 = vpop.f32.mrf.mxu0  ;;  %v1384_v45 = vmul.f32 %v1288_v6, %v3592_v19  ;;  %v2609_v53 = vpop.eup %2608  ;;  %v1112_v44 = vmul.f32 0.70710677, %v3737_v61  ;;  %v1113_v43 = vmul.f32 0.70710677, %v3747_v27  ;;  %v1382_v3 = vmul.f32 %v1286_v54, %v3575_v21 }
 0x1a6   : > { %v1387_v41 = vmul.f32 %v1291_v15, %v3585_v20  ;;  %v2611_v26 = vpop.eup %2610  ;;  %v3766_v0 = vmul.f32 0.5, %v3661_v2  ;;  %2628 = verf.f32 %v1126_v40  ;;  %1637 = vmatprep.mubr.f32.mxu1 %v1383_v7  ;;  %v1290_v32 = vadd.f32 1.0, %v2595_v63 }
 0x1a7   : > { %2372 = vmatprep.mubr.f32.mxu0 %v1384_v45  ;;  %v3770_v19 = vadd.f32 %v3688_v42, %v3259_v62  ;;  %v3773_v18 = vmul.f32 0.5, %v3677_v36  ;;  %2630 = verf.f32 %v1113_v43  ;;  %1638 = vmatmul.mubr.f32.gmra.mxu1 %v1382_v3  ;;  %v1289_v21 = vadd.f32 1.0, %v3697_v29  ;;  %v702_v57 = vpop.f32.mrf.mxu0 }
 0x1a8   : > { %2373 = vmatmul.mubr.f32.gmra.mxu0 %v1387_v41  ;;  %v1294_v20 = vadd.f32 1.0, %v2601_v33  ;;  %2632 = verf.f32 %v1129_v25  ;;  %v1115_v2 = vmul.f32 0.70710677, %v3759_v13  ;;  %v1386_v5 = vmul.f32 %v1290_v32, %v3618_v10 }
 0x1a9   : > { %v1116_v63 = vmul.f32 0.70710677, %v3770_v19  ;;  %v2613_v28 = vpop.eup %2612  ;;  %2634 = verf.f32 %v1112_v44  ;;  %v1385_v42 = vmul.f32 %v1289_v21, %v3612_v9  ;;  %v3782_v36 = vadd.f32 %v3704_v8, %v3255_v60  ;;  %v704_v30 = vpop.f32.mrf.mxu0 }
 0x1aa   : > { %v1390_v1 = vmul.f32 %v1294_v20, %v3656_v46  ;;  %v2615_v29 = vpop.eup %2614  ;;  %1642 = vmatprep.mubr.f32.mxu1 %v1386_v5  ;;  %v1293_v11 = vadd.f32 1.0, %v2603_v31  ;;  %v1297_v22 = vadd.f32 1.0, %v3711_v35  ;;  %v3787_v10 = vadd.f32 %v692_v38, %v3259_v62 }
 0x1ab   : > { %2636 = verf.f32 %v1116_v63  ;;  %v2617_v33 = vpop.eup %2616  ;;  %v3790_v40 = vmul.f32 0.5, %v3680_v47  ;;  %v3793_v9 = vmul.f32 0.5, %v3683_v52  ;;  %1643 = vmatmul.mubr.f32.gmra.mxu1 %v1385_v42  ;;  %v1292_v46 = vadd.f32 1.0, %v3722_v4  ;;  %v708_v44 = vpop.f32.mrf.mxu0 }
 0x1ac   : > { %2375 = vmatprep.mubr.f32.mxu0 %v1390_v1  ;;  %v1300_v8 = vadd.f32 1.0, %v2609_v53  ;;  %v2619_v6 = vpop.eup %2618  ;;  %2638 = verf.f32 %v1115_v2  ;;  %v1389_v35 = vmul.f32 %v1293_v11, %v3658_v49  ;;  %v1393_v38 = vmul.f32 %v1297_v22, %v3632_v34 }
 0x1ad   : > { %v1119_v31 = vmul.f32 0.70710677, %v3787_v10  ;;  %v2621_v25 = vpop.eup %2620  ;;  %v1118_v47 = vmul.f32 0.70710677, %v3782_v36  ;;  %v1388_v52 = vmul.f32 %v1292_v46, %v3642_v50  ;;  %v3803_v54 = vadd.f32 %v3739_v12, %v3255_v60 }
 0x1ae   : > { %v1396_v4 = vmul.f32 %v1300_v8, %v3707_v56  ;;  %v2623_v15 = vpop.eup %2622  ;;  %1647 = vmatprep.mubr.f32.mxu1 %v1389_v35  ;;  %2376 = vmatmul.mubr.f32.gmra.mxu0 %v1393_v38  ;;  %v1296_v49 = vadd.f32 1.0, %v2611_v26  ;;  %v1303_v34 = vadd.f32 1.0, %v3742_v23  ;;  %v3809_v7 = vadd.f32 %v3751_v39, %v3259_v62 }
 0x1af   : > { %2640 = verf.f32 %v1119_v31  ;;  %v2625_v45 = vpop.eup %2624  ;;  %v1014_v50 = vmul.f32 0.5, %v3702_v55  ;;  %1648 = vmatmul.mubr.f32.gmra.mxu1 %v1388_v52  ;;  %v1295_v12 = vadd.f32 1.0, %v3753_v14  ;;  %v3814_v56 = vadd.f32 %v702_v57, %v3255_v60 }
 0x1b0   : > { %2378 = vmatprep.mubr.f32.mxu0 %v1396_v4  ;;  %v1306_v53 = vadd.f32 1.0, %v2617_v33  ;;  %v3817_v43 = vmul.f32 0.5, %v3717_v16  ;;  %v1392_v23 = vmul.f32 %v1296_v49, %v3714_v59  ;;  %v1399_v39 = vmul.f32 %v1303_v34, %v3691_v48 }
 0x1b1   : > { %v1122_v3 = vmul.f32 0.70710677, %v3809_v7  ;;  %v2627_v41 = vpop.eup %2626  ;;  %2642 = verf.f32 %v1118_v47  ;;  %v1121_v55 = vmul.f32 0.70710677, %v3803_v54  ;;  %v1391_v14 = vmul.f32 %v1295_v12, %v3694_v58  ;;  %v710_v58 = vpop.f32.mrf.mxu0 }
 0x1b2   : > { %v1402_v26 = vmul.f32 %v1306_v53, %v3733_v37  ;;  %1652 = vmatprep.mubr.f32.mxu1 %v1392_v23  ;;  %2379 = vmatmul.mubr.f32.gmra.mxu0 %v1399_v39  ;;  %v1299_v32 = vadd.f32 1.0, %v2619_v6  ;;  %v1309_v16 = vadd.f32 1.0, %v2613_v28  ;;  %v3826_v21 = vadd.f32 %v704_v30, %v3259_v62 }
 0x1b3   : > { %2644 = verf.f32 %v1122_v3  ;;  %v2629_v59 = vpop.eup %2628  ;;  %v1030_v48 = vmul.f32 0.5, %v3720_v17  ;;  %1653 = vmatmul.mubr.f32.gmra.mxu1 %v1391_v14  ;;  %v1124_v20 = vmul.f32 0.70710677, %v3814_v56  ;;  %v1298_v57 = vadd.f32 1.0, %v2615_v29 }
 0x1b4   : > { %2381 = vmatprep.mubr.f32.mxu0 %v1402_v26  ;;  %v1312_v2 = vadd.f32 1.0, %v2625_v45  ;;  %v2631_v5 = vpop.eup %2630  ;;  %v1395_v37 = vmul.f32 %v1299_v32, %v3766_v0  ;;  %v1405_v63 = vmul.f32 %v1309_v16, %v3725_v24  ;;  %v1125_v28 = vmul.f32 0.70710677, %v3826_v21 }
 0x1b5   : > { %v3834_v42 = vadd.f32 %v708_v44, %v3255_v60  ;;  %v2633_v1 = vpop.eup %2632  ;;  %v1017_v17 = vmul.f32 0.5, %v3747_v27  ;;  %2646 = verf.f32 %v1121_v55  ;;  %v1394_v11 = vmul.f32 %v1298_v57, %v3730_v51 }
 0x1b6   : > { %v1408_v29 = vmul.f32 %v1312_v2, %v3793_v9  ;;  %v2635_v22 = vpop.eup %2634  ;;  %1657 = vmatprep.mubr.f32.mxu1 %v1395_v37  ;;  %2382 = vmatmul.mubr.f32.gmra.mxu0 %v1405_v63  ;;  %2648 = verf.f32 %v1125_v28  ;;  %v1302_v0 = vadd.f32 1.0, %v2627_v41  ;;  %v1315_v33 = vadd.f32 1.0, %v2621_v25 }
 0x1b7   : > { %v3840_v24 = vadd.f32 %v710_v58, %v3259_v62  ;;  %2650 = verf.f32 %v1124_v20  ;;  %1658 = vmatmul.mubr.f32.gmra.mxu1 %v1394_v11  ;;  %v1301_v60 = vadd.f32 1.0, %v2623_v15  ;;  %v1318_v27 = vadd.f32 1.0, %v2629_v59 }
 0x1b8   : > { %v2637_v46 = vpop.eup %2636  ;;  %2384 = vmatprep.mubr.f32.mxu0 %v1408_v29  ;;  %v1305_v8 = vadd.f32 1.0, %v2631_v5  ;;  %v1127_v51 = vmul.f32 0.70710677, %v3834_v42  ;;  %v1398_v30 = vmul.f32 %v1302_v0, %v1014_v50  ;;  %v1411_v9 = vmul.f32 %v1315_v33, %v3773_v18 }
 0x1b9   : > { %v1128_v6 = vmul.f32 0.70710677, %v3840_v24  ;;  %v2639_v35 = vpop.eup %2638  ;;  %v1397_v38 = vmul.f32 %v1301_v60, %v3790_v40  ;;  %v1414_v31 = vmul.f32 %v1318_v27, %v1030_v48  ;;  %v1321_v25 = vadd.f32 1.0, %v2633_v1 }
 0x1ba   : > { %v1401_v62 = vmul.f32 %v1305_v8, %v1017_v17  ;;  %v1020_v47 = vmul.f32 0.5, %v3770_v19  ;;  %1662 = vmatprep.mubr.f32.mxu1 %v1398_v30  ;;  %2385 = vmatmul.mubr.f32.gmra.mxu0 %v1411_v9  ;;  %v1304_v52 = vadd.f32 1.0, %v2635_v22  ;;  %v1308_v4 = vadd.f32 1.0, %v2637_v46  ;;  %v3861_v17 = vld [vmem:[%s3985_s4] ss:$0 sm:$0xff] }
 0x1bb   : > { %2652 = verf.f32 %v1128_v6  ;;  %v1016_v49 = vmul.f32 0.5, %v3737_v61  ;;  %1663 = vmatmul.mubr.f32.gmra.mxu1 %v1397_v38  ;;  %2387 = vmatprep.mubr.f32.mxu0 %v1414_v31  ;;  %v1417_v18 = vmul.f32 %v1321_v25, %v3817_v43  ;;  %v1307_v50 = vadd.f32 1.0, %v2639_v35 }
 0x1bc   : > { %v2641_v15 = vpop.eup %2640  ;;  %1667 = vmatprep.mubr.f32.mxu1 %v1401_v62  ;;  %v1404_v34 = vmul.f32 %v1308_v4, %v1020_v47  ;;  %2654 = verf.f32 %v1127_v51  ;;  %v1023_v19 = vmul.f32 0.5, %v3787_v10  ;;  %v1019_v44 = vmul.f32 0.5, %v3759_v13 }
 0x1bd   : > { %v1311_v40 = vadd.f32 1.0, %v2641_v15  ;;  %v1400_v45 = vmul.f32 %v1304_v52, %v1016_v49  ;;  %v1026_v41 = vmul.f32 0.5, %v3809_v7  ;;  %v1022_v14 = vmul.f32 0.5, %v3782_v36 }
 0x1be   : > { %v2643_v12 = vpop.eup %2642  ;;  %2388 = vmatmul.mubr.f32.gmra.mxu0 %v1417_v18  ;;  %v1403_v39 = vmul.f32 %v1307_v50, %v1019_v44  ;;  %v1029_v13 = vmul.f32 0.5, %v3826_v21  ;;  %v1025_v20 = vmul.f32 0.5, %v3803_v54  ;;  %v1032_v36 = vmul.f32 0.5, %v3840_v24 }
 0x1bf   : > { %1668 = vmatmul.mubr.f32.gmra.mxu1 %v1400_v45  ;;  %v1407_v61 = vmul.f32 %v1311_v40, %v1023_v19  ;;  %v1310_v3 = vadd.f32 1.0, %v2643_v12  ;;  %v1028_v37 = vmul.f32 0.5, %v3814_v56  ;;  %v1031_v1 = vmul.f32 0.5, %v3834_v42 }
 0x1c0   : > { %v2645_v53 = vpop.eup %2644  ;;  %1672 = vmatprep.mubr.f32.mxu1 %v1404_v34 }
 0x1c1   : > { %v1314_v23 = vadd.f32 1.0, %v2645_v53  ;;  %v1406_v16 = vmul.f32 %v1310_v3, %v1022_v14 }
 0x1c2   : > { %v2647_v43 = vpop.eup %2646 }
 0x1c3   : > { %v2649_v55 = vpop.eup %2648  ;;  %1673 = vmatmul.mubr.f32.gmra.mxu1 %v1403_v39  ;;  %v1410_v10 = vmul.f32 %v1314_v23, %v1026_v41  ;;  %v1313_v59 = vadd.f32 1.0, %v2647_v43 }
 0x1c4   : > { %v2651_v26 = vpop.eup %2650  ;;  %1677 = vmatprep.mubr.f32.mxu1 %v1407_v61  ;;  %v1317_v32 = vadd.f32 1.0, %v2649_v55 }
 0x1c5   : > { %v1409_v7 = vmul.f32 %v1313_v59, %v1025_v20  ;;  %v1316_v58 = vadd.f32 1.0, %v2651_v26 }
 0x1c6   : > { %v1413_v57 = vmul.f32 %v1317_v32, %v1029_v13 }
 0x1c7   : > { %1678 = vmatmul.mubr.f32.gmra.mxu1 %v1406_v16  ;;  %v1412_v28 = vmul.f32 %v1316_v58, %v1028_v37 }
 0x1c8   : > { %v2653_v48 = vpop.eup %2652  ;;  %1682 = vmatprep.mubr.f32.mxu1 %v1410_v10 }
 0x1c9   : > { %v1320_v2 = vadd.f32 1.0, %v2653_v48  ;;  %v2655_v5 = vpop.eup %2654 }
 0x1ca   : > { %v1319_v21 = vadd.f32 1.0, %v2655_v5 }
 0x1cb   : > { %1683 = vmatmul.mubr.f32.gmra.mxu1 %v1409_v7  ;;  %v1416_v63 = vmul.f32 %v1320_v2, %v1032_v36 }
 0x1cc   : > { %1687 = vmatprep.mubr.f32.mxu1 %v1413_v57  ;;  %v1415_v54 = vmul.f32 %v1319_v21, %v1031_v1 }
 0x1cf   : > { %1688 = vmatmul.mubr.f32.gmra.mxu1 %v1412_v28 }
 0x1d0   : > { %1692 = vmatprep.mubr.f32.mxu1 %v1416_v63 }
 0x1d3   : > { %1693 = vmatmul.mubr.f32.gmra.mxu1 %v1415_v54 }
 0x209   : > { %v1539_v11 = vpop.f32.mrf.mxu1 }
 0x20a   : > { %v1540_v56 = vadd.f32 %v3861_v17, %v1539_v11  ;;  %v2344_v29 = vpop.f32.mrf.mxu0 }
 0x20b   : > { %v1541_v22 = vpop.f32.mrf.mxu1 }
 0x20c   : > { %v1764_v0 = vpop.f32.mrf.mxu0 }
 0x20d   : > { %v1765_v33 = vadd.f32 %v1764_v0, %v1540_v56  ;;  %v1544_v24 = vpop.f32.mrf.mxu1 }
 0x20e   : > { %v1545_v42 = vadd.f32 %v3861_v17, %v1544_v24 }
 0x20f   : > { %1923 = vst [vmem:[%s3866_s12] sm:$0xff] %v1765_v33  ;;  %v1546_v46 = vpop.f32.mrf.mxu1 }
 0x210   : > { %v1770_v60 = vadd.f32 %v2344_v29, %v1545_v42 }
 0x211   : > { %v1549_v27 = vpop.f32.mrf.mxu1  ;;  %v2347_v51 = vpop.f32.mrf.mxu0 }
 0x212   : > { %1924 = vst [vmem:[%s3866_s12 + $0x8] sm:$0xff] %v1770_v60  ;;  %v1550_v8 = vadd.f32 %v3861_v17, %v1549_v27 }
 0x213   : > { %v1551_v30 = vpop.f32.mrf.mxu1  ;;  %v1774_v9 = vpop.f32.mrf.mxu0 }
 0x214   : > { %v1775_v6 = vadd.f32 %v1774_v9, %v1550_v8 }
 0x215   : > { %v1554_v35 = vpop.f32.mrf.mxu1 }
 0x216   : > { %v1555_v38 = vadd.f32 %v3861_v17, %v1554_v35  ;;  %1925 = vst [vmem:[%s3866_s12 + $0x10] sm:$0xff] %v1775_v6 }
 0x217   : > { %v1556_v31 = vpop.f32.mrf.mxu1 }
 0x218   : > { %v1780_v62 = vadd.f32 %v2347_v51, %v1555_v38 }
 0x219   : > { %v1559_v25 = vpop.f32.mrf.mxu1 }
 0x21a   : > { %1926 = vst [vmem:[%s3866_s12 + $0x18] sm:$0xff] %v1780_v62  ;;  %v1560_v47 = vadd.f32 %v3861_v17, %v1559_v25 }
 0x21b   : > { %v2350_v52 = vpop.f32.mrf.mxu0  ;;  %v1561_v4 = vpop.f32.mrf.mxu1 }
 0x21d   : > { %v1784_v15 = vpop.f32.mrf.mxu0  ;;  %v1564_v49 = vpop.f32.mrf.mxu1 }
 0x21e   : > { %v1785_v18 = vadd.f32 %v1784_v15, %v1560_v47  ;;  %v1565_v34 = vadd.f32 %v3861_v17, %v1564_v49 }
 0x21f   : > { %v1566_v40 = vpop.f32.mrf.mxu1 }
 0x220   : > { %1927 = vst [vmem:[%s3866_s12 + $0x20] sm:$0xff] %v1785_v18  ;;  %v1790_v45 = vadd.f32 %v2350_v52, %v1565_v34 }
 0x222   : > { %1928 = vst [vmem:[%s3866_s12 + $0x28] sm:$0xff] %v1790_v45 }
 0x224   : > { %v1569_v50 = vpop.f32.mrf.mxu1 }
 0x225   : > { %v1570_v12 = vadd.f32 %v3861_v17, %v1569_v50  ;;  %v2353_v19 = vpop.f32.mrf.mxu0 }
 0x226   : > { %v1571_v53 = vpop.f32.mrf.mxu1 }
 0x227   : > { %v1794_v44 = vpop.f32.mrf.mxu0 }
 0x228   : > { %v1574_v61 = vpop.f32.mrf.mxu1  ;;  %v1795_v23 = vadd.f32 %v1794_v44, %v1570_v12 }
 0x229   : > { %v1575_v39 = vadd.f32 %v3861_v17, %v1574_v61 }
 0x22a   : > { %v1576_v3 = vpop.f32.mrf.mxu1  ;;  %1929 = vst [vmem:[%s3866_s12 + $0x30] sm:$0xff] %v1795_v23 }
 0x22b   : > { %v1800_v43 = vadd.f32 %v2353_v19, %v1575_v39 }
 0x22d   : > { %1930 = vst [vmem:[%s3866_s12 + $0x38] sm:$0xff] %v1800_v43  ;;  %v1579_v41 = vpop.f32.mrf.mxu1 }
 0x22e   : > { %v1580_v55 = vadd.f32 %v3861_v17, %v1579_v41 }
 0x22f   : > { %v2356_v14 = vpop.f32.mrf.mxu0  ;;  %v1581_v26 = vpop.f32.mrf.mxu1 }
 0x231   : > { %v1804_v10 = vpop.f32.mrf.mxu0  ;;  %v1584_v16 = vpop.f32.mrf.mxu1 }
 0x232   : > { %v1805_v32 = vadd.f32 %v1804_v10, %v1580_v55  ;;  %v1585_v59 = vadd.f32 %v3861_v17, %v1584_v16 }
 0x233   : > { %v1586_v13 = vpop.f32.mrf.mxu1 }
 0x234   : > { %1931 = vst [vmem:[%s3866_s12 + $0x40] sm:$0xff] %v1805_v32  ;;  %v1810_v48 = vadd.f32 %v2356_v14, %v1585_v59 }
 0x236   : > { %1932 = vst [vmem:[%s3866_s12 + $0x48] sm:$0xff] %v1810_v48  ;;  %v1589_v20 = vpop.f32.mrf.mxu1  ;;  %v2359_v57 = vpop.f32.mrf.mxu0 }
 0x237   : > { %v1590_v2 = vadd.f32 %v3861_v17, %v1589_v20 }
 0x238   : > { %v1591_v7 = vpop.f32.mrf.mxu1  ;;  %v1814_v58 = vpop.f32.mrf.mxu0 }
 0x239   : > { %v1815_v5 = vadd.f32 %v1814_v58, %v1590_v2 }
 0x23a   : > { %v1594_v36 = vpop.f32.mrf.mxu1 }
 0x23b   : > { %1933 = vst [vmem:[%s3866_s12 + $0x50] sm:$0xff] %v1815_v5  ;;  %v1595_v37 = vadd.f32 %v3861_v17, %v1594_v36 }
 0x23c   : > { %v1596_v63 = vpop.f32.mrf.mxu1 }
 0x23d   : > { %v1820_v28 = vadd.f32 %v2359_v57, %v1595_v37 }
 0x23f   : > { %1934 = vst [vmem:[%s3866_s12 + $0x58] sm:$0xff] %v1820_v28  ;;  %v1599_v21 = vpop.f32.mrf.mxu1  ;;  %v2362_v1 = vpop.f32.mrf.mxu0 }
 0x240   : > { %v1600_v54 = vadd.f32 %v3861_v17, %v1599_v21 }
 0x241   : > { %v1601_v11 = vpop.f32.mrf.mxu1  ;;  %v1824_v56 = vpop.f32.mrf.mxu0 }
 0x242   : > { %v1825_v29 = vadd.f32 %v1824_v56, %v1600_v54 }
 0x243   : > { %v1604_v22 = vpop.f32.mrf.mxu1 }
 0x244   : > { %1935 = vst [vmem:[%s3866_s12 + $0x60] sm:$0xff] %v1825_v29  ;;  %v1605_v0 = vadd.f32 %v3861_v17, %v1604_v22 }
 0x245   : > { %v1606_v33 = vpop.f32.mrf.mxu1 }
 0x246   : > { %v1830_v24 = vadd.f32 %v2362_v1, %v1605_v0 }
 0x248   : > { %1936 = vst [vmem:[%s3866_s12 + $0x68] sm:$0xff] %v1830_v24 }
 0x249   : > { %v1609_v42 = vpop.f32.mrf.mxu1 }
 0x24a   : > { %v2365_v46 = vpop.f32.mrf.mxu0  ;;  %v1610_v60 = vadd.f32 %v3861_v17, %v1609_v42 }
 0x24b   : > { %v1611_v27 = vpop.f32.mrf.mxu1 }
 0x24c   : > { %v1834_v8 = vpop.f32.mrf.mxu0 }
 0x24d   : > { %v1835_v51 = vadd.f32 %v1834_v8, %v1610_v60  ;;  %v1614_v30 = vpop.f32.mrf.mxu1 }
 0x24e   : > { %v1615_v9 = vadd.f32 %v3861_v17, %v1614_v30 }
 0x24f   : > { %1937 = vst [vmem:[%s3866_s12 + $0x70] sm:$0xff] %v1835_v51  ;;  %v1616_v6 = vpop.f32.mrf.mxu1 }
 0x250   : > { %v1840_v35 = vadd.f32 %v2365_v46, %v1615_v9 }
 0x252   : > { %v1619_v38 = vpop.f32.mrf.mxu1  ;;  %1938 = vst [vmem:[%s3866_s12 + $0x78] sm:$0xff] %v1840_v35 }
 0x253   : > { %v1620_v31 = vadd.f32 %v3861_v17, %v1619_v38  ;;  %v2368_v62 = vpop.f32.mrf.mxu0 }
 0x254   : > { %v1621_v25 = vpop.f32.mrf.mxu1 }
 0x255   : > { %v1844_v47 = vpop.f32.mrf.mxu0 }
 0x256   : > { %v1845_v52 = vadd.f32 %v1844_v47, %v1620_v31 }
 0x257   : > { %v1624_v4 = vpop.f32.mrf.mxu1 }
 0x258   : > { %1939 = vst [vmem:[%s3866_s12 + $0x80] sm:$0xff] %v1845_v52  ;;  %v1625_v15 = vadd.f32 %v3861_v17, %v1624_v4 }
 0x259   : > { %v1626_v49 = vpop.f32.mrf.mxu1 }
 0x25a   : > { %v1850_v18 = vadd.f32 %v2368_v62, %v1625_v15 }
 0x25c   : > { %1940 = vst [vmem:[%s3866_s12 + $0x88] sm:$0xff] %v1850_v18 }
 0x25d   : > { %v1629_v34 = vpop.f32.mrf.mxu1 }
 0x25e   : > { %v2371_v40 = vpop.f32.mrf.mxu0  ;;  %v1630_v45 = vadd.f32 %v3861_v17, %v1629_v34 }
 0x25f   : > { %v1631_v50 = vpop.f32.mrf.mxu1 }
 0x260   : > { %v1854_v12 = vpop.f32.mrf.mxu0 }
 0x261   : > { %v1855_v19 = vadd.f32 %v1854_v12, %v1630_v45 }
 0x263   : > { %1941 = vst [vmem:[%s3866_s12 + $0x90] sm:$0xff] %v1855_v19  ;;  %v1634_v53 = vpop.f32.mrf.mxu1 }
 0x264   : > { %v1635_v44 = vadd.f32 %v3861_v17, %v1634_v53 }
 0x265   : > { %v1636_v61 = vpop.f32.mrf.mxu1 }
 0x266   : > { %v1860_v23 = vadd.f32 %v2371_v40, %v1635_v44 }
 0x267   : > { %v1639_v39 = vpop.f32.mrf.mxu1 }
 0x268   : > { %1942 = vst [vmem:[%s3866_s12 + $0x98] sm:$0xff] %v1860_v23  ;;  %v2374_v3 = vpop.f32.mrf.mxu0  ;;  %v1640_v43 = vadd.f32 %v3861_v17, %v1639_v39 }
 0x269   : > { %v1641_v41 = vpop.f32.mrf.mxu1 }
 0x26a   : > { %v1864_v55 = vpop.f32.mrf.mxu0 }
 0x26b   : > { %v1865_v14 = vadd.f32 %v1864_v55, %v1640_v43  ;;  %v1644_v26 = vpop.f32.mrf.mxu1 }
 0x26c   : > { %v1645_v10 = vadd.f32 %v3861_v17, %v1644_v26 }
 0x26d   : > { %1943 = vst [vmem:[%s3866_s12 + $0xa0] sm:$0xff] %v1865_v14  ;;  %v1646_v32 = vpop.f32.mrf.mxu1 }
 0x26e   : > { %v1870_v16 = vadd.f32 %v2374_v3, %v1645_v10  ;;  %v2377_v59 = vpop.f32.mrf.mxu0 }
 0x26f   : > { %v1649_v13 = vpop.f32.mrf.mxu1 }
 0x270   : > { %1944 = vst [vmem:[%s3866_s12 + $0xa8] sm:$0xff] %v1870_v16  ;;  %v1650_v48 = vadd.f32 %v3861_v17, %v1649_v13  ;;  %v1874_v20 = vpop.f32.mrf.mxu0 }
 0x271   : > { %v1651_v57 = vpop.f32.mrf.mxu1 }
 0x272   : > { %v1875_v2 = vadd.f32 %v1874_v20, %v1650_v48  ;;  %v2380_v5 = vpop.f32.mrf.mxu0 }
 0x273   : > { %v1654_v7 = vpop.f32.mrf.mxu1 }
 0x274   : > { %1945 = vst [vmem:[%s3866_s12 + $0xb0] sm:$0xff] %v1875_v2  ;;  %v1655_v58 = vadd.f32 %v3861_v17, %v1654_v7  ;;  %v1884_v21 = vpop.f32.mrf.mxu0 }
 0x275   : > { %v1656_v36 = vpop.f32.mrf.mxu1 }
 0x276   : > { %v1880_v37 = vadd.f32 %v2377_v59, %v1655_v58  ;;  %v2383_v29 = vpop.f32.mrf.mxu0 }
 0x277   : > { %v1659_v63 = vpop.f32.mrf.mxu1 }
 0x278   : > { %1946 = vst [vmem:[%s3866_s12 + $0xb8] sm:$0xff] %v1880_v37  ;;  %v1660_v28 = vadd.f32 %v3861_v17, %v1659_v63  ;;  %v1894_v42 = vpop.f32.mrf.mxu0 }
 0x279   : > { %v1661_v1 = vpop.f32.mrf.mxu1 }
 0x27a   : > { %v1885_v54 = vadd.f32 %v1884_v21, %v1660_v28  ;;  %v2386_v51 = vpop.f32.mrf.mxu0 }
 0x27b   : > { %v1664_v11 = vpop.f32.mrf.mxu1 }
 0x27c   : > { %1947 = vst [vmem:[%s3866_s12 + $0xc0] sm:$0xff] %v1885_v54  ;;  %v1665_v56 = vadd.f32 %v3861_v17, %v1664_v11  ;;  %v1904_v38 = vpop.f32.mrf.mxu0 }
 0x27d   : > { %v1666_v22 = vpop.f32.mrf.mxu1 }
 0x27e   : > { %v1890_v0 = vadd.f32 %v2380_v5, %v1665_v56  ;;  %v2389_v52 = vpop.f32.mrf.mxu0 }
 0x27f   : > { %v1669_v33 = vpop.f32.mrf.mxu1 }
 0x280   : > { %1948 = vst [vmem:[%s3866_s12 + $0xc8] sm:$0xff] %v1890_v0  ;;  %v1670_v24 = vadd.f32 %v3861_v17, %v1669_v33  ;;  %v1914_v34 = vpop.f32.mrf.mxu0 }
 0x281   : > { %v1671_v46 = vpop.f32.mrf.mxu1 }
 0x282   : > { %v1895_v60 = vadd.f32 %v1894_v42, %v1670_v24 }
 0x283   : > { %v1674_v27 = vpop.f32.mrf.mxu1 }
 0x284   : > { %1949 = vst [vmem:[%s3866_s12 + $0xd0] sm:$0xff] %v1895_v60  ;;  %v1675_v8 = vadd.f32 %v3861_v17, %v1674_v27 }
 0x285   : > { %v1676_v30 = vpop.f32.mrf.mxu1 }
 0x286   : > { %v1900_v9 = vadd.f32 %v2383_v29, %v1675_v8 }
 0x287   : > { %v1679_v6 = vpop.f32.mrf.mxu1 }
 0x288   : > { %1950 = vst [vmem:[%s3866_s12 + $0xd8] sm:$0xff] %v1900_v9  ;;  %v1680_v35 = vadd.f32 %v3861_v17, %v1679_v6 }
 0x289   : > { %v1681_v31 = vpop.f32.mrf.mxu1 }
 0x28a   : > { %v1905_v62 = vadd.f32 %v1904_v38, %v1680_v35 }
 0x28b   : > { %v1684_v25 = vpop.f32.mrf.mxu1 }
 0x28c   : > { %1951 = vst [vmem:[%s3866_s12 + $0xe0] sm:$0xff] %v1905_v62  ;;  %v1685_v47 = vadd.f32 %v3861_v17, %v1684_v25 }
 0x28d   : > { %v1686_v4 = vpop.f32.mrf.mxu1 }
 0x28e   : > { %v1910_v15 = vadd.f32 %v2386_v51, %v1685_v47 }
 0x28f   : > { %v1689_v49 = vpop.f32.mrf.mxu1 }
 0x290   : > { %1952 = vst [vmem:[%s3866_s12 + $0xe8] sm:$0xff] %v1910_v15  ;;  %v1690_v18 = vadd.f32 %v3861_v17, %v1689_v49 }
 0x291   : > { %v1691_v40 = vpop.f32.mrf.mxu1 }
 0x292   : > { %v1915_v45 = vadd.f32 %v1914_v34, %v1690_v18 }
 0x293   : > { %v1694_v50 = vpop.f32.mrf.mxu1 }
 0x294   : > { %1953 = vst [vmem:[%s3866_s12 + $0xf0] sm:$0xff] %v1915_v45  ;;  %v1695_v12 = vadd.f32 %v3861_v17, %v1694_v50 }
 0x295   : > { %v1696_v19 = vpop.f32.mrf.mxu1 }
 0x296   : > { %v1920_v53 = vadd.f32 %v2389_v52, %v1695_v12 }
 0x298   : > { %1954 = vst [vmem:[%s3866_s12 + $0xf8] sm:$0xff] %v1920_v53 }
 0x299   : > { %2749 = shalt.err (!%p2746_p9)
}
 0x29a   : > { %s2750_s15 = scalar_lea.hbm %s3935_s11, 4096  ;;  %s2754_s14 = scalar_lea.hbm %s3986_s5, 8192 }
 0x29b   : > { %p2751_p13 = scmp.ne.s32.totalorder %s3935_s11, %s2750_s15  ;;  %p2755_p4 = scmp.lt.s32.totalorder %s3935_s11, %s3986_s5 }
 0x29c   : > { %p2756_p8 = scmp.lt.s32.totalorder %s2754_s14, %s2750_s15 }
 0x29d   : > { %p2752_p5 = pnand %p2751_p13, %p4004_p10 }
 0x29e   : > { %p2757_p7 = por %p2756_p8, %p2755_p4 }
 0x29f   : > { %p2753_p0 = pneg %p2752_p5 }
 0x2a1   : > { %p2758_p11 = pnand %p2757_p7, %p2753_p0 }
 0x2a3   : > { %2761 = shalt.err (!%p2758_p11)
}
 0x2a4   : > { %s2815_s16 = smov 128   ;;  %s2816_s9 = smov 8  }
 0x2a5   : > { %2400 = dma.vmem_to_hbm [thread:$0]  (%p4004_p10), %s3937_s8, 4096, %s3935_s11, %s1956_s27, %s2815_s16, %s2815_s16, %s2816_s9  }
 0x2a6 PF: > { %s1984_s30 = sand.u32 1, %s2792_s18   ;;  %p4005_p1 = scmp.ne.s32.totalorder %s3993_s25, 0 }
 0x2a7   : > { %p4006_p2 = scmp.ge.s32.totalorder %s2804_s21, 2  ;;  %s1985_s22 = scalar_lea.sflag [#allocation4], %s1984_s30 }
 0x2a9   : > { %p2414_p6 = pnand %p4006_p2, %p4005_p1 }
 0x2ab   : > { %p2415_p12 = pneg %p2414_p6 }
 0x2ad   : > { %2787 = dma.done.wait (%p2415_p12), %s1985_s22, 4096  }
 0x2ae   : > { %2789 = vsyncadd (%p2415_p12), %s1985_s22, 4294963200  ;;  %p19_p3 = scmp.ge.s32.totalorder %s2922_s17, 4   ;;  %s4007_s18 = smov %s2796_s19 }
 0x2af   : > { %s4008_s19 = smov %s2800_s20  ;;  %s4009_s20 = smov %s2931_s28 }
 0x2b0   : > { %s4010_s21 = smov %s2922_s17  ;;  %21 = sbr.rel (!%p19_p3) target bundleno = 6 (0x6), region = 93 }
 0x2b5   :  { %1990 = vsyncpa [#allocation3], 1 }
 0x2b6   :  { %1992 = vsyncpa [#allocation3 + $0x1], 1 }
 0x2b7   :  { %1993 = vsyncpa [#allocation6], 1 }
 0x2b8   :  { %1994 = vsyncpa [#allocation4], 1 }
 0x2b9   :  { %1996 = vsyncpa [#allocation4 + $0x1], 1 }

</bundles_post_ra>
